<compile_context>
chip_gen: v7x
topology: tpu7x:2x2x1
jax: 0.10.0
libtpu: 0.0.40
codegen_flags: <defaults>
</compile_context>

<pallas_src>
import functools
import math

import jax
import jax.numpy as jnp
from jax import lax
from jax.experimental import pallas as pl
from jax.experimental.pallas import tpu as pltpu


CFG = dict(vocab=50, max_pos=16, hidden=32, heads=4, ffn=64, layers=2, num_labels=3)
LN_EPS = 1e-12
NEG_BIG = -1e9   # finite additive mask -> no NaN even for fully-masked rows
LANE = 128

# dot_general dimension numbers for transposed-operand 2-D matmuls (MXU-native forms).
_DN_TA = (((0,), (0,)), ((), ()))   # contract dim0 of both:  a^T @ b
_DN_TB = (((1,), (1,)), ((), ()))   # contract dim1 of both:  a @ b^T


def _round_up(n, m):
    return ((n + m - 1) // m) * m


# ------------------------------------------------------------------ fused layer kernel
def _layer_kernel(*refs, num_heads, head_dim, fuse_input_ln, fuse_classifier):
    it = iter(refs)
    x_ref = next(it)
    mask_ref = next(it)
    if fuse_input_ln:
        in_g_ref, in_b_ref = next(it), next(it)
    qkv_wT_ref, qkv_bT_ref = next(it), next(it)
    o_w_ref, o_b_ref = next(it), next(it)
    sa_g_ref, sa_b_ref = next(it), next(it)
    ff1_w_ref, ff1_b_ref = next(it), next(it)
    ff2_w_ref, ff2_b_ref = next(it), next(it)
    out_g_ref, out_b_ref = next(it), next(it)
    if fuse_classifier:
        cls_w_ref, cls_b_ref = next(it), next(it)
    o_ref = next(it)
    if fuse_classifier:
        logits_ref = next(it)

    S, Hp = x_ref.shape
    H = num_heads * head_dim

    # LayerNorm over the *real* H columns of the lane-padded activation (fp32 VPU math);
    # gamma/beta are zero in the padded columns, so padded lanes stay exactly zero.
    col = lax.broadcasted_iota(jnp.int32, (1, Hp), 1)
    valid = (col < H).astype(jnp.float32)

    def ln(v, g, b):
        mean = jnp.sum(v, axis=-1, keepdims=True) * (1.0 / H)
        d = (v - mean) * valid
        var = jnp.sum(d * d, axis=-1, keepdims=True) * (1.0 / H)
        return d * lax.rsqrt(var + LN_EPS) * g + b

    x = x_ref[...]                                                       # (S, Hp) f32
    if fuse_input_ln:                                                    # embedding LN fused in
        x = ln(x, in_g_ref[...], in_b_ref[...])

    # Additive key mask built in-register from this sequence's mask row (1=keep, 0=pad).
    b_idx = pl.program_id(0)
    add_mask = (1.0 - mask_ref[pl.ds(b_idx, 1), :]) * NEG_BIG            # (1, S) f32

    # Fused QKV projection, produced directly in head-transposed layout:
    #   qkvT[r, s] = (x @ Wqkv)[s, r],  rows r = [Q heads | K heads | V heads],
    # weight stored pre-transposed (bf16), 1/sqrt(head_dim) folded into the Q rows.
    xb = x.astype(jnp.bfloat16)
    qkvT = lax.dot_general(qkv_wT_ref[...], xb, _DN_TB,
                           preferred_element_type=jnp.float32) + qkv_bT_ref[...]  # (3H, S)

    # Per-head attention on sublane-aligned row blocks of qkvT (no lane slicing, no
    # concatenate); head context is contracted straight into the output projection.
    # TODO(synk): at production S, tile the KV axis with flash-style online softmax.
    attn = jnp.zeros((S, Hp), jnp.float32)
    for h in range(num_heads):
        qT = qkvT[h * head_dim:(h + 1) * head_dim, :].astype(jnp.bfloat16)          # (DH, S)
        kT = qkvT[H + h * head_dim:H + (h + 1) * head_dim, :].astype(jnp.bfloat16)  # (DH, S)
        vT = qkvT[2 * H + h * head_dim:2 * H + (h + 1) * head_dim, :].astype(jnp.bfloat16)
        s = lax.dot_general(qT, kT, _DN_TA,
                            preferred_element_type=jnp.float32)                      # (S, S)
        s = s + add_mask
        m = jnp.max(s, axis=-1, keepdims=True)
        e = jnp.exp(s - m)
        p = e * pl.reciprocal(jnp.sum(e, axis=-1, keepdims=True), approx=True)
        ctxT = lax.dot_general(vT, p.astype(jnp.bfloat16), _DN_TB,
                               preferred_element_type=jnp.float32)                   # (DH, S)
        attn = attn + lax.dot_general(
            ctxT.astype(jnp.bfloat16),
            o_w_ref[h * head_dim:(h + 1) * head_dim, :], _DN_TA,
            preferred_element_type=jnp.float32)                                      # (S, Hp)
    attn = attn + o_b_ref[...]

    x2 = ln(x + attn, sa_g_ref[...], sa_b_ref[...])

    h1 = jnp.dot(x2.astype(jnp.bfloat16), ff1_w_ref[...],
                 preferred_element_type=jnp.float32) + ff1_b_ref[...]
    # TODO(synk): HF DistilBERT uses exact erf-GELU; tanh-approx GELU (EUP tanh) used here.
    h1 = jax.nn.gelu(h1, approximate=True)
    ff = jnp.dot(h1.astype(jnp.bfloat16), ff2_w_ref[...],
                 preferred_element_type=jnp.float32) + ff2_b_ref[...]
    out = ln(x2 + ff, out_g_ref[...], out_b_ref[...])
    o_ref[...] = out                                                     # lane-dense store

    if fuse_classifier:
        # Lane-dense classifier epilogue computed for every row; the wrapper keeps only
        # the CLS row (row 0 of each sequence) and the real num_labels columns.
        logits_ref[...] = jnp.dot(out.astype(jnp.bfloat16), cls_w_ref[...],
                                  preferred_element_type=jnp.float32) + cls_b_ref[...]


def transformer_layer(x, mask, lw, *, batch, seq, num_heads, head_dim,
                      input_ln=None, classifier=None):
    """One fused encoder layer.  x: [batch*seq, Hp] f32, mask: [batch, seq] f32."""
    Hp = x.shape[1]
    fuse_in_ln = input_ln is not None
    fuse_cls = classifier is not None
    kern = functools.partial(_layer_kernel, num_heads=num_heads, head_dim=head_dim,
                             fuse_input_ln=fuse_in_ln, fuse_classifier=fuse_cls)

    rows = lambda b: (b, 0)      # per-sequence row block of the activation (lane-dense)
    const = lambda b: (0, 0)     # whole-array block: DMA'd once, stays VMEM-resident

    def whole(arr):
        return pl.BlockSpec(arr.shape, const)

    operands = [x, mask]
    in_specs = [pl.BlockSpec((seq, Hp), rows), whole(mask)]
    if fuse_in_ln:
        operands += list(input_ln)
        in_specs += [whole(a) for a in input_ln]
    wkeys = ("qkv_wT", "qkv_bT", "o_w", "o_b", "sa_ln_g", "sa_ln_b",
             "ff1_w", "ff1_b", "ff2_w", "ff2_b", "out_ln_g", "out_ln_b")
    operands += [lw[k] for k in wkeys]
    in_specs += [whole(lw[k]) for k in wkeys]
    if fuse_cls:
        operands += list(classifier)
        in_specs += [whole(a) for a in classifier]

    out_shape = [jax.ShapeDtypeStruct((batch * seq, Hp), jnp.float32)]
    out_specs = [pl.BlockSpec((seq, Hp), rows)]
    if fuse_cls:
        n_pad = classifier[0].shape[1]
        out_shape.append(jax.ShapeDtypeStruct((batch * seq, n_pad), jnp.float32))
        out_specs.append(pl.BlockSpec((seq, n_pad), rows))

    return pl.pallas_call(
        kern,
        out_shape=tuple(out_shape),
        grid=(batch,),
        in_specs=in_specs,
        out_specs=tuple(out_specs),
        compiler_params=pltpu.CompilerParams(
            dimension_semantics=("parallel",),
            vmem_limit_bytes=48 * 1024 * 1024),
    )(*operands)


# ------------------------------------------------------------------ params & one-time prep
def init_params(key, cfg):
    H, F = cfg["hidden"], cfg["ffn"]

    def nrm(k, shape, std=0.02):
        return (std * jax.random.normal(k, shape)).astype(jnp.float32)

    keys = iter(jax.random.split(key, 64))
    ones = lambda n: jnp.ones((n,), jnp.float32)
    zeros = lambda n: jnp.zeros((n,), jnp.float32)

    params = {
        "word_emb": nrm(next(keys), (cfg["vocab"], H)),
        "pos_emb": nrm(next(keys), (cfg["max_pos"], H)),
        "emb_ln_g": ones(H), "emb_ln_b": zeros(H),
        "layers": [],
        "cls_w": nrm(next(keys), (H, cfg["num_labels"])),
        "cls_b": zeros(cfg["num_labels"]),
    }
    for _ in range(cfg["layers"]):
        params["layers"].append({
            "q_w": nrm(next(keys), (H, H)), "q_b": zeros(H),
            "k_w": nrm(next(keys), (H, H)), "k_b": zeros(H),
            "v_w": nrm(next(keys), (H, H)), "v_b": zeros(H),
            "o_w": nrm(next(keys), (H, H)), "o_b": zeros(H),
            "sa_ln_g": ones(H), "sa_ln_b": zeros(H),
            "ff1_w": nrm(next(keys), (H, F)), "ff1_b": zeros(F),
            "ff2_w": nrm(next(keys), (F, H)), "ff2_b": zeros(H),
            "out_ln_g": ones(H), "out_ln_b": zeros(H),
        })
    return params


def prepare_params(params, cfg):
    """One-time (hoisted) prep: fuse QKV + fold scale, pre-transpose, pad to lane width,
    cast matmul weights to bf16.  Nothing here runs on the per-call critical path."""
    H, F, NH = cfg["hidden"], cfg["ffn"], cfg["heads"]
    DH = H // NH
    Hp = _round_up(H, LANE)
    Fp = _round_up(F, LANE)
    Np = _round_up(cfg["num_labels"], LANE)
    scale = 1.0 / math.sqrt(DH)

    def pad_mat(a, rows, cols, dtype):
        out = jnp.zeros((rows, cols), dtype)
        return out.at[: a.shape[0], : a.shape[1]].set(a.astype(dtype))

    def pad_vec(v, cols, dtype=jnp.float32):
        out = jnp.zeros((1, cols), dtype)
        return out.at[0, : v.shape[0]].set(v.astype(dtype))

    prep = {
        "word_emb": pad_mat(params["word_emb"], params["word_emb"].shape[0], Hp, jnp.float32),
        "pos_emb": pad_mat(params["pos_emb"], params["pos_emb"].shape[0], Hp, jnp.float32),
        "emb_ln_g": pad_vec(params["emb_ln_g"], Hp),
        "emb_ln_b": pad_vec(params["emb_ln_b"], Hp),
        "cls_w": pad_mat(params["cls_w"], Hp, Np, jnp.bfloat16),
        "cls_b": pad_vec(params["cls_b"], Np),
        "layers": [],
    }
    for lyr in params["layers"]:
        qkv_w = jnp.concatenate([lyr["q_w"] * scale, lyr["k_w"], lyr["v_w"]], axis=1)  # (H, 3H)
        qkv_b = jnp.concatenate([lyr["q_b"] * scale, lyr["k_b"], lyr["v_b"]])          # (3H,)
        prep["layers"].append({
            "qkv_wT": pad_mat(qkv_w.T, 3 * H, Hp, jnp.bfloat16),          # (3H, Hp)
            "qkv_bT": qkv_b.reshape(3 * H, 1).astype(jnp.float32),        # (3H, 1)
            "o_w": pad_mat(lyr["o_w"], H, Hp, jnp.bfloat16),
            "o_b": pad_vec(lyr["o_b"], Hp),
            "sa_ln_g": pad_vec(lyr["sa_ln_g"], Hp),
            "sa_ln_b": pad_vec(lyr["sa_ln_b"], Hp),
            "ff1_w": pad_mat(lyr["ff1_w"], Hp, Fp, jnp.bfloat16),
            "ff1_b": pad_vec(lyr["ff1_b"], Fp),
            "ff2_w": pad_mat(lyr["ff2_w"], Fp, Hp, jnp.bfloat16),
            "ff2_b": pad_vec(lyr["ff2_b"], Hp),
            "out_ln_g": pad_vec(lyr["out_ln_g"], Hp),
            "out_ln_b": pad_vec(lyr["out_ln_b"], Hp),
        })
    return prep


# ------------------------------------------------------------------ model forward
def distilbert_classifier(prep, input_ids, attention_mask, cfg):
    B, S = input_ids.shape
    NH, H = cfg["heads"], cfg["hidden"]
    DH = H // NH
    Hp = prep["word_emb"].shape[1]

    # Embedding gather (glue) -- tables are pre-padded to the lane width at prep time.
    x = prep["word_emb"][input_ids] + prep["pos_emb"][:S][None, :, :]
    x = x.reshape(B * S, Hp)
    mask = attention_mask.astype(jnp.float32)                           # [B, S]

    n_layers = len(prep["layers"])
    logits_rows = None
    for li, lw in enumerate(prep["layers"]):
        res = transformer_layer(
            x, mask, lw, batch=B, seq=S, num_heads=NH, head_dim=DH,
            input_ln=(prep["emb_ln_g"], prep["emb_ln_b"]) if li == 0 else None,
            classifier=(prep["cls_w"], prep["cls_b"]) if li == n_layers - 1 else None)
        x = res[0]
        if li == n_layers - 1:
            logits_rows = res[1]

    # CLS pooling (row 0 of each sequence); dropout is identity at inference.
    logits = logits_rows.reshape(B, S, -1)[:, 0, :cfg["num_labels"]]
    return logits


# ------------------------------------------------------------------ pure-JAX reference
def reference_forward(params, input_ids, attention_mask, cfg):
    H, NH = cfg["hidden"], cfg["heads"]
    DH = H // NH
    B, S = input_ids.shape

    def ln(v, g, b):
        mu = jnp.mean(v, -1, keepdims=True)
        var = jnp.mean(jnp.square(v - mu), -1, keepdims=True)
        return (v - mu) * lax.rsqrt(var + LN_EPS) * g + b

    x = params["word_emb"][input_ids] + params["pos_emb"][:S][None]
    x = ln(x, params["emb_ln_g"], params["emb_ln_b"])
    add_mask = (1.0 - attention_mask.astype(jnp.float32))[:, None, None, :] * NEG_BIG
    for lyr in params["layers"]:
        def heads(t):
            return t.reshape(B, S, NH, DH).transpose(0, 2, 1, 3)
        q = heads(x @ lyr["q_w"] + lyr["q_b"])
        k = heads(x @ lyr["k_w"] + lyr["k_b"])
        v = heads(x @ lyr["v_w"] + lyr["v_b"])
        s = jnp.einsum("bhqd,bhkd->bhqk", q, k) / math.sqrt(DH) + add_mask
        p = jax.nn.softmax(s, axis=-1)
        ctx = jnp.einsum("bhqk,bhkd->bhqd", p, v).transpose(0, 2, 1, 3).reshape(B, S, H)
        x = ln(x + ctx @ lyr["o_w"] + lyr["o_b"], lyr["sa_ln_g"], lyr["sa_ln_b"])
        h1 = jax.nn.gelu(x @ lyr["ff1_w"] + lyr["ff1_b"], approximate=True)
        x = ln(x + h1 @ lyr["ff2_w"] + lyr["ff2_b"], lyr["out_ln_g"], lyr["out_ln_b"])
    return x[:, 0] @ params["cls_w"] + params["cls_b"]


# ------------------------------------------------------------------ main
if __name__ == "__main__":
    cfg = CFG
    key = jax.random.PRNGKey(0)
    pkey, ikey = jax.random.split(key)
    params = init_params(pkey, cfg)
    prep = prepare_params(params, cfg)      # hoisted one-time weight fusion / padding / bf16

    B, S = 2, 8
    input_ids = jax.random.randint(ikey, (B, S), 0, cfg["vocab"], dtype=jnp.int32)
    attention_mask = jnp.ones((B, S), jnp.int32).at[1, 6:].set(0)   # pad last 2 tokens of seq 1

    forward = jax.jit(functools.partial(distilbert_classifier, cfg=cfg))
    logits = forward(prep, input_ids, attention_mask)
    jax.block_until_ready(logits)

    assert logits.shape == (B, cfg["num_labels"])
    ref = reference_forward(params, input_ids, attention_mask, cfg)
    max_diff = float(jnp.max(jnp.abs(logits - ref)))
    assert max_diff < 5e-2, f"kernel vs reference mismatch: {max_diff}"
    print("KERNEL_OK")
</pallas_src>

<mosaic_0001>
module attributes {stable_mosaic.version = 11 : i64} {
  func.func @_layer_kernel(%arg0: i32, %arg1: memref<8x128xf32, #tpu.memory_space<vmem>>, %arg2: memref<2x8xf32, #tpu.memory_space<vmem>>, %arg3: memref<96x128xbf16, #tpu.memory_space<vmem>>, %arg4: memref<96x1xf32, #tpu.memory_space<vmem>>, %arg5: memref<32x128xbf16, #tpu.memory_space<vmem>>, %arg6: memref<1x128xf32, #tpu.memory_space<vmem>>, %arg7: memref<1x128xf32, #tpu.memory_space<vmem>>, %arg8: memref<1x128xf32, #tpu.memory_space<vmem>>, %arg9: memref<128x128xbf16, #tpu.memory_space<vmem>>, %arg10: memref<1x128xf32, #tpu.memory_space<vmem>>, %arg11: memref<128x128xbf16, #tpu.memory_space<vmem>>, %arg12: memref<1x128xf32, #tpu.memory_space<vmem>>, %arg13: memref<1x128xf32, #tpu.memory_space<vmem>>, %arg14: memref<1x128xf32, #tpu.memory_space<vmem>>, %arg15: memref<128x128xbf16, #tpu.memory_space<vmem>>, %arg16: memref<1x128xf32, #tpu.memory_space<vmem>>, %arg17: memref<8x128xf32, #tpu.memory_space<vmem>>, %arg18: memref<8x128xf32, #tpu.memory_space<vmem>>) attributes {dimension_semantics = [#tpu.dimension_semantics<parallel>], iteration_bounds = array<i64: 2>, scalar_prefetch = 0 : i64, scratch_operands = 0 : i64, tpu.core_type = #tpu.core_type<tc>, window_params = [{transform_indices = @transform_0, window_bounds = array<i64: 8, 128>}, {pipeline_mode = #tpu.pipeline_mode<synchronous>, transform_indices = @transform_1, window_bounds = array<i64: 2, 8>}, {pipeline_mode = #tpu.pipeline_mode<synchronous>, transform_indices = @transform_2, window_bounds = array<i64: 96, 128>}, {pipeline_mode = #tpu.pipeline_mode<synchronous>, transform_indices = @transform_3, window_bounds = array<i64: 96, 1>}, {pipeline_mode = #tpu.pipeline_mode<synchronous>, transform_indices = @transform_4, window_bounds = array<i64: 32, 128>}, {pipeline_mode = #tpu.pipeline_mode<synchronous>, transform_indices = @transform_5, window_bounds = array<i64: 1, 128>}, {pipeline_mode = #tpu.pipeline_mode<synchronous>, transform_indices = @transform_6, window_bounds = array<i64: 1, 128>}, {pipeline_mode = #tpu.pipeline_mode<synchronous>, transform_indices = @transform_7, window_bounds = array<i64: 1, 128>}, {pipeline_mode = #tpu.pipeline_mode<synchronous>, transform_indices = @transform_8, window_bounds = array<i64: 128, 128>}, {pipeline_mode = #tpu.pipeline_mode<synchronous>, transform_indices = @transform_9, window_bounds = array<i64: 1, 128>}, {pipeline_mode = #tpu.pipeline_mode<synchronous>, transform_indices = @transform_10, window_bounds = array<i64: 128, 128>}, {pipeline_mode = #tpu.pipeline_mode<synchronous>, transform_indices = @transform_11, window_bounds = array<i64: 1, 128>}, {pipeline_mode = #tpu.pipeline_mode<synchronous>, transform_indices = @transform_12, window_bounds = array<i64: 1, 128>}, {pipeline_mode = #tpu.pipeline_mode<synchronous>, transform_indices = @transform_13, window_bounds = array<i64: 1, 128>}, {pipeline_mode = #tpu.pipeline_mode<synchronous>, transform_indices = @transform_14, window_bounds = array<i64: 128, 128>}, {pipeline_mode = #tpu.pipeline_mode<synchronous>, transform_indices = @transform_15, window_bounds = array<i64: 1, 128>}, {transform_indices = @transform_16, window_bounds = array<i64: 8, 128>}, {transform_indices = @transform_17, window_bounds = array<i64: 8, 128>}]} {
    %0 = tpu.iota {dimensions = array<i32: 1>} : vector<1x128xi32>
    %c32_i32 = arith.constant 32 : i32
    %1 = vector.broadcast %c32_i32 : i32 to vector<1x128xi32>
    %2 = arith.cmpi slt, %0, %1 : vector<1x128xi32>
    %3 = arith.extui %2 : vector<1x128xi1> to vector<1x128xi32>
    %4 = arith.sitofp %3 : vector<1x128xi32> to vector<1x128xf32>
    %c0 = arith.constant 0 : index
    %c0_0 = arith.constant 0 : index
    %5 = vector.load %arg1[%c0, %c0_0] : memref<8x128xf32, #tpu.memory_space<vmem>>, vector<8x128xf32>
    %6 = arith.index_cast %arg0 : i32 to index
    %c0_1 = arith.constant 0 : index
    %7 = vector.load %arg2[%6, %c0_1] : memref<2x8xf32, #tpu.memory_space<vmem>>, vector<1x8xf32>
    %cst = arith.constant 1.000000e+00 : f32
    %8 = vector.broadcast %cst : f32 to vector<1x8xf32>
    %9 = arith.subf %8, %7 : vector<1x8xf32>
    %cst_2 = arith.constant -1.000000e+09 : f32
    %10 = vector.broadcast %cst_2 : f32 to vector<1x8xf32>
    %11 = arith.mulf %9, %10 : vector<1x8xf32>
    %12 = arith.truncf %5 : vector<8x128xf32> to vector<8x128xbf16>
    %c0_3 = arith.constant 0 : index
    %c0_4 = arith.constant 0 : index
    %13 = vector.load %arg3[%c0_3, %c0_4] : memref<96x128xbf16, #tpu.memory_space<vmem>>, vector<96x128xbf16>
    %cst_5 = arith.constant dense<0.000000e+00> : vector<96x8xf32>
    %14 = tpu.matmul %13, %12, %cst_5 {dimension_numbers = #tpu.dot_dimension_numbers<[1], [1], [0], [0], [0, 0, 1, 0], [], []>} : vector<96x128xbf16>, vector<8x128xbf16>, vector<96x8xf32> -> vector<96x8xf32>
    %c0_6 = arith.constant 0 : index
    %c0_7 = arith.constant 0 : index
    %15 = vector.load %arg4[%c0_6, %c0_7] : memref<96x1xf32, #tpu.memory_space<vmem>>, vector<96x1xf32>
    %16 = vector.broadcast %15 : vector<96x1xf32> to vector<96x8xf32>
    %17 = arith.addf %14, %16 : vector<96x8xf32>
    %cst_8 = arith.constant 0.000000e+00 : f32
    %18 = vector.broadcast %cst_8 : f32 to vector<8x128xf32>
    %19 = vector.extract_strided_slice %17 {offsets = [0, 0], sizes = [8, 8], strides = [1, 1]} : vector<96x8xf32> to vector<8x8xf32>
    %20 = arith.truncf %19 : vector<8x8xf32> to vector<8x8xbf16>
    %21 = vector.extract_strided_slice %17 {offsets = [32, 0], sizes = [8, 8], strides = [1, 1]} : vector<96x8xf32> to vector<8x8xf32>
    %22 = arith.truncf %21 : vector<8x8xf32> to vector<8x8xbf16>
    %23 = vector.extract_strided_slice %17 {offsets = [64, 0], sizes = [8, 8], strides = [1, 1]} : vector<96x8xf32> to vector<8x8xf32>
    %24 = arith.truncf %23 : vector<8x8xf32> to vector<8x8xbf16>
    %cst_9 = arith.constant dense<0.000000e+00> : vector<8x8xf32>
    %25 = tpu.matmul %20, %22, %cst_9 {dimension_numbers = #tpu.dot_dimension_numbers<[0], [0], [1], [1], [0, 1, 1, 1], [], []>} : vector<8x8xbf16>, vector<8x8xbf16>, vector<8x8xf32> -> vector<8x8xf32>
    %26 = vector.broadcast %11 : vector<1x8xf32> to vector<8x8xf32>
    %27 = arith.addf %25, %26 : vector<8x8xf32>
    %cst_10 = arith.constant dense<0xFF800000> : vector<8xf32>
    %28 = vector.multi_reduction <maximumf>, %27, %cst_10 [1] : vector<8x8xf32> to vector<8xf32>
    %29 = vector.shape_cast %28 : vector<8xf32> to vector<8x1xf32>
    %30 = vector.broadcast %29 : vector<8x1xf32> to vector<8x8xf32>
    %31 = arith.subf %27, %30 : vector<8x8xf32>
    %32 = math.exp %31 : vector<8x8xf32>
    %cst_11 = arith.constant dense<0.000000e+00> : vector<8xf32>
    %33 = vector.multi_reduction <add>, %32, %cst_11 [1] : vector<8x8xf32> to vector<8xf32>
    %34 = vector.shape_cast %33 : vector<8xf32> to vector<8x1xf32>
    %35 = tpu.reciprocal %34 {approx = true} : vector<8x1xf32> -> vector<8x1xf32>
    %36 = vector.broadcast %35 : vector<8x1xf32> to vector<8x8xf32>
    %37 = arith.mulf %32, %36 : vector<8x8xf32>
    %38 = arith.truncf %37 : vector<8x8xf32> to vector<8x8xbf16>
    %cst_12 = arith.constant dense<0.000000e+00> : vector<8x8xf32>
    %39 = tpu.matmul %24, %38, %cst_12 {dimension_numbers = #tpu.dot_dimension_numbers<[1], [1], [0], [0], [0, 0, 1, 0], [], []>} : vector<8x8xbf16>, vector<8x8xbf16>, vector<8x8xf32> -> vector<8x8xf32>
    %40 = arith.truncf %39 : vector<8x8xf32> to vector<8x8xbf16>
    %c0_13 = arith.constant 0 : index
    %c0_14 = arith.constant 0 : index
    %41 = vector.load %arg5[%c0_13, %c0_14] : memref<32x128xbf16, #tpu.memory_space<vmem>>, vector<8x128xbf16>
    %cst_15 = arith.constant dense<0.000000e+00> : vector<8x128xf32>
    %42 = tpu.matmul %40, %41, %cst_15 {dimension_numbers = #tpu.dot_dimension_numbers<[0], [0], [1], [1], [0, 1, 1, 1], [], []>} : vector<8x8xbf16>, vector<8x128xbf16>, vector<8x128xf32> -> vector<8x128xf32>
    %43 = arith.addf %18, %42 : vector<8x128xf32>
    %44 = vector.extract_strided_slice %17 {offsets = [8, 0], sizes = [8, 8], strides = [1, 1]} : vector<96x8xf32> to vector<8x8xf32>
    %45 = arith.truncf %44 : vector<8x8xf32> to vector<8x8xbf16>
    %46 = vector.extract_strided_slice %17 {offsets = [40, 0], sizes = [8, 8], strides = [1, 1]} : vector<96x8xf32> to vector<8x8xf32>
    %47 = arith.truncf %46 : vector<8x8xf32> to vector<8x8xbf16>
    %48 = vector.extract_strided_slice %17 {offsets = [72, 0], sizes = [8, 8], strides = [1, 1]} : vector<96x8xf32> to vector<8x8xf32>
    %49 = arith.truncf %48 : vector<8x8xf32> to vector<8x8xbf16>
    %cst_16 = arith.constant dense<0.000000e+00> : vector<8x8xf32>
    %50 = tpu.matmul %45, %47, %cst_16 {dimension_numbers = #tpu.dot_dimension_numbers<[0], [0], [1], [1], [0, 1, 1, 1], [], []>} : vector<8x8xbf16>, vector<8x8xbf16>, vector<8x8xf32> -> vector<8x8xf32>
    %51 = vector.broadcast %11 : vector<1x8xf32> to vector<8x8xf32>
    %52 = arith.addf %50, %51 : vector<8x8xf32>
    %cst_17 = arith.constant dense<0xFF800000> : vector<8xf32>
    %53 = vector.multi_reduction <maximumf>, %52, %cst_17 [1] : vector<8x8xf32> to vector<8xf32>
    %54 = vector.shape_cast %53 : vector<8xf32> to vector<8x1xf32>
    %55 = vector.broadcast %54 : vector<8x1xf32> to vector<8x8xf32>
    %56 = arith.subf %52, %55 : vector<8x8xf32>
    %57 = math.exp %56 : vector<8x8xf32>
    %cst_18 = arith.constant dense<0.000000e+00> : vector<8xf32>
    %58 = vector.multi_reduction <add>, %57, %cst_18 [1] : vector<8x8xf32> to vector<8xf32>
    %59 = vector.shape_cast %58 : vector<8xf32> to vector<8x1xf32>
    %60 = tpu.reciprocal %59 {approx = true} : vector<8x1xf32> -> vector<8x1xf32>
    %61 = vector.broadcast %60 : vector<8x1xf32> to vector<8x8xf32>
    %62 = arith.mulf %57, %61 : vector<8x8xf32>
    %63 = arith.truncf %62 : vector<8x8xf32> to vector<8x8xbf16>
    %cst_19 = arith.constant dense<0.000000e+00> : vector<8x8xf32>
    %64 = tpu.matmul %49, %63, %cst_19 {dimension_numbers = #tpu.dot_dimension_numbers<[1], [1], [0], [0], [0, 0, 1, 0], [], []>} : vector<8x8xbf16>, vector<8x8xbf16>, vector<8x8xf32> -> vector<8x8xf32>
    %65 = arith.truncf %64 : vector<8x8xf32> to vector<8x8xbf16>
    %c8 = arith.constant 8 : index
    %c0_20 = arith.constant 0 : index
    %66 = vector.load %arg5[%c8, %c0_20] : memref<32x128xbf16, #tpu.memory_space<vmem>>, vector<8x128xbf16>
    %cst_21 = arith.constant dense<0.000000e+00> : vector<8x128xf32>
    %67 = tpu.matmul %65, %66, %cst_21 {dimension_numbers = #tpu.dot_dimension_numbers<[0], [0], [1], [1], [0, 1, 1, 1], [], []>} : vector<8x8xbf16>, vector<8x128xbf16>, vector<8x128xf32> -> vector<8x128xf32>
    %68 = arith.addf %43, %67 : vector<8x128xf32>
    %69 = vector.extract_strided_slice %17 {offsets = [16, 0], sizes = [8, 8], strides = [1, 1]} : vector<96x8xf32> to vector<8x8xf32>
    %70 = arith.truncf %69 : vector<8x8xf32> to vector<8x8xbf16>
    %71 = vector.extract_strided_slice %17 {offsets = [48, 0], sizes = [8, 8], strides = [1, 1]} : vector<96x8xf32> to vector<8x8xf32>
    %72 = arith.truncf %71 : vector<8x8xf32> to vector<8x8xbf16>
    %73 = vector.extract_strided_slice %17 {offsets = [80, 0], sizes = [8, 8], strides = [1, 1]} : vector<96x8xf32> to vector<8x8xf32>
    %74 = arith.truncf %73 : vector<8x8xf32> to vector<8x8xbf16>
    %cst_22 = arith.constant dense<0.000000e+00> : vector<8x8xf32>
    %75 = tpu.matmul %70, %72, %cst_22 {dimension_numbers = #tpu.dot_dimension_numbers<[0], [0], [1], [1], [0, 1, 1, 1], [], []>} : vector<8x8xbf16>, vector<8x8xbf16>, vector<8x8xf32> -> vector<8x8xf32>
    %76 = vector.broadcast %11 : vector<1x8xf32> to vector<8x8xf32>
    %77 = arith.addf %75, %76 : vector<8x8xf32>
    %cst_23 = arith.constant dense<0xFF800000> : vector<8xf32>
    %78 = vector.multi_reduction <maximumf>, %77, %cst_23 [1] : vector<8x8xf32> to vector<8xf32>
    %79 = vector.shape_cast %78 : vector<8xf32> to vector<8x1xf32>
    %80 = vector.broadcast %79 : vector<8x1xf32> to vector<8x8xf32>
    %81 = arith.subf %77, %80 : vector<8x8xf32>
    %82 = math.exp %81 : vector<8x8xf32>
    %cst_24 = arith.constant dense<0.000000e+00> : vector<8xf32>
    %83 = vector.multi_reduction <add>, %82, %cst_24 [1] : vector<8x8xf32> to vector<8xf32>
    %84 = vector.shape_cast %83 : vector<8xf32> to vector<8x1xf32>
    %85 = tpu.reciprocal %84 {approx = true} : vector<8x1xf32> -> vector<8x1xf32>
    %86 = vector.broadcast %85 : vector<8x1xf32> to vector<8x8xf32>
    %87 = arith.mulf %82, %86 : vector<8x8xf32>
    %88 = arith.truncf %87 : vector<8x8xf32> to vector<8x8xbf16>
    %cst_25 = arith.constant dense<0.000000e+00> : vector<8x8xf32>
    %89 = tpu.matmul %74, %88, %cst_25 {dimension_numbers = #tpu.dot_dimension_numbers<[1], [1], [0], [0], [0, 0, 1, 0], [], []>} : vector<8x8xbf16>, vector<8x8xbf16>, vector<8x8xf32> -> vector<8x8xf32>
    %90 = arith.truncf %89 : vector<8x8xf32> to vector<8x8xbf16>
    %c16 = arith.constant 16 : index
    %c0_26 = arith.constant 0 : index
    %91 = vector.load %arg5[%c16, %c0_26] : memref<32x128xbf16, #tpu.memory_space<vmem>>, vector<8x128xbf16>
    %cst_27 = arith.constant dense<0.000000e+00> : vector<8x128xf32>
    %92 = tpu.matmul %90, %91, %cst_27 {dimension_numbers = #tpu.dot_dimension_numbers<[0], [0], [1], [1], [0, 1, 1, 1], [], []>} : vector<8x8xbf16>, vector<8x128xbf16>, vector<8x128xf32> -> vector<8x128xf32>
    %93 = arith.addf %68, %92 : vector<8x128xf32>
    %94 = vector.extract_strided_slice %17 {offsets = [24, 0], sizes = [8, 8], strides = [1, 1]} : vector<96x8xf32> to vector<8x8xf32>
    %95 = arith.truncf %94 : vector<8x8xf32> to vector<8x8xbf16>
    %96 = vector.extract_strided_slice %17 {offsets = [56, 0], sizes = [8, 8], strides = [1, 1]} : vector<96x8xf32> to vector<8x8xf32>
    %97 = arith.truncf %96 : vector<8x8xf32> to vector<8x8xbf16>
    %98 = vector.extract_strided_slice %17 {offsets = [88, 0], sizes = [8, 8], strides = [1, 1]} : vector<96x8xf32> to vector<8x8xf32>
    %99 = arith.truncf %98 : vector<8x8xf32> to vector<8x8xbf16>
    %cst_28 = arith.constant dense<0.000000e+00> : vector<8x8xf32>
    %100 = tpu.matmul %95, %97, %cst_28 {dimension_numbers = #tpu.dot_dimension_numbers<[0], [0], [1], [1], [0, 1, 1, 1], [], []>} : vector<8x8xbf16>, vector<8x8xbf16>, vector<8x8xf32> -> vector<8x8xf32>
    %101 = vector.broadcast %11 : vector<1x8xf32> to vector<8x8xf32>
    %102 = arith.addf %100, %101 : vector<8x8xf32>
    %cst_29 = arith.constant dense<0xFF800000> : vector<8xf32>
    %103 = vector.multi_reduction <maximumf>, %102, %cst_29 [1] : vector<8x8xf32> to vector<8xf32>
    %104 = vector.shape_cast %103 : vector<8xf32> to vector<8x1xf32>
    %105 = vector.broadcast %104 : vector<8x1xf32> to vector<8x8xf32>
    %106 = arith.subf %102, %105 : vector<8x8xf32>
    %107 = math.exp %106 : vector<8x8xf32>
    %cst_30 = arith.constant dense<0.000000e+00> : vector<8xf32>
    %108 = vector.multi_reduction <add>, %107, %cst_30 [1] : vector<8x8xf32> to vector<8xf32>
    %109 = vector.shape_cast %108 : vector<8xf32> to vector<8x1xf32>
    %110 = tpu.reciprocal %109 {approx = true} : vector<8x1xf32> -> vector<8x1xf32>
    %111 = vector.broadcast %110 : vector<8x1xf32> to vector<8x8xf32>
    %112 = arith.mulf %107, %111 : vector<8x8xf32>
    %113 = arith.truncf %112 : vector<8x8xf32> to vector<8x8xbf16>
    %cst_31 = arith.constant dense<0.000000e+00> : vector<8x8xf32>
    %114 = tpu.matmul %99, %113, %cst_31 {dimension_numbers = #tpu.dot_dimension_numbers<[1], [1], [0], [0], [0, 0, 1, 0], [], []>} : vector<8x8xbf16>, vector<8x8xbf16>, vector<8x8xf32> -> vector<8x8xf32>
    %115 = arith.truncf %114 : vector<8x8xf32> to vector<8x8xbf16>
    %c24 = arith.constant 24 : index
    %c0_32 = arith.constant 0 : index
    %116 = vector.load %arg5[%c24, %c0_32] : memref<32x128xbf16, #tpu.memory_space<vmem>>, vector<8x128xbf16>
    %cst_33 = arith.constant dense<0.000000e+00> : vector<8x128xf32>
    %117 = tpu.matmul %115, %116, %cst_33 {dimension_numbers = #tpu.dot_dimension_numbers<[0], [0], [1], [1], [0, 1, 1, 1], [], []>} : vector<8x8xbf16>, vector<8x128xbf16>, vector<8x128xf32> -> vector<8x128xf32>
    %118 = arith.addf %93, %117 : vector<8x128xf32>
    %c0_34 = arith.constant 0 : index
    %c0_35 = arith.constant 0 : index
    %119 = vector.load %arg6[%c0_34, %c0_35] : memref<1x128xf32, #tpu.memory_space<vmem>>, vector<1x128xf32>
    %120 = vector.broadcast %119 : vector<1x128xf32> to vector<8x128xf32>
    %121 = arith.addf %118, %120 : vector<8x128xf32>
    %122 = arith.addf %5, %121 : vector<8x128xf32>
    %c0_36 = arith.constant 0 : index
    %c0_37 = arith.constant 0 : index
    %123 = vector.load %arg7[%c0_36, %c0_37] : memref<1x128xf32, #tpu.memory_space<vmem>>, vector<1x128xf32>
    %c0_38 = arith.constant 0 : index
    %c0_39 = arith.constant 0 : index
    %124 = vector.load %arg8[%c0_38, %c0_39] : memref<1x128xf32, #tpu.memory_space<vmem>>, vector<1x128xf32>
    %cst_40 = arith.constant dense<0.000000e+00> : vector<8xf32>
    %125 = vector.multi_reduction <add>, %122, %cst_40 [1] : vector<8x128xf32> to vector<8xf32>
    %126 = vector.shape_cast %125 : vector<8xf32> to vector<8x1xf32>
    %cst_41 = arith.constant 3.125000e-02 : f32
    %127 = vector.broadcast %cst_41 : f32 to vector<8x1xf32>
    %128 = arith.mulf %126, %127 : vector<8x1xf32>
    %129 = vector.broadcast %128 : vector<8x1xf32> to vector<8x128xf32>
    %130 = arith.subf %122, %129 : vector<8x128xf32>
    %131 = vector.broadcast %4 : vector<1x128xf32> to vector<8x128xf32>
    %132 = arith.mulf %130, %131 : vector<8x128xf32>
    %133 = arith.mulf %132, %132 : vector<8x128xf32>
    %cst_42 = arith.constant dense<0.000000e+00> : vector<8xf32>
    %134 = vector.multi_reduction <add>, %133, %cst_42 [1] : vector<8x128xf32> to vector<8xf32>
    %135 = vector.shape_cast %134 : vector<8xf32> to vector<8x1xf32>
    %cst_43 = arith.constant 3.125000e-02 : f32
    %136 = vector.broadcast %cst_43 : f32 to vector<8x1xf32>
    %137 = arith.mulf %135, %136 : vector<8x1xf32>
    %cst_44 = arith.constant 9.99999996E-13 : f32
    %138 = vector.broadcast %cst_44 : f32 to vector<8x1xf32>
    %139 = arith.addf %137, %138 : vector<8x1xf32>
    %140 = math.rsqrt %139 : vector<8x1xf32>
    %141 = vector.broadcast %140 : vector<8x1xf32> to vector<8x128xf32>
    %142 = arith.mulf %132, %141 : vector<8x128xf32>
    %143 = vector.broadcast %123 : vector<1x128xf32> to vector<8x128xf32>
    %144 = arith.mulf %142, %143 : vector<8x128xf32>
    %145 = vector.broadcast %124 : vector<1x128xf32> to vector<8x128xf32>
    %146 = arith.addf %144, %145 : vector<8x128xf32>
    %147 = arith.truncf %146 : vector<8x128xf32> to vector<8x128xbf16>
    %c0_45 = arith.constant 0 : index
    %c0_46 = arith.constant 0 : index
    %148 = vector.load %arg9[%c0_45, %c0_46] : memref<128x128xbf16, #tpu.memory_space<vmem>>, vector<128x128xbf16>
    %cst_47 = arith.constant dense<0.000000e+00> : vector<8x128xf32>
    %149 = tpu.matmul %147, %148, %cst_47 {dimension_numbers = #tpu.dot_dimension_numbers<[1], [0], [0], [1], [0, 0, 1, 1], [], []>} : vector<8x128xbf16>, vector<128x128xbf16>, vector<8x128xf32> -> vector<8x128xf32>
    %c0_48 = arith.constant 0 : index
    %c0_49 = arith.constant 0 : index
    %150 = vector.load %arg10[%c0_48, %c0_49] : memref<1x128xf32, #tpu.memory_space<vmem>>, vector<1x128xf32>
    %151 = vector.broadcast %150 : vector<1x128xf32> to vector<8x128xf32>
    %152 = arith.addf %149, %151 : vector<8x128xf32>
    %153 = arith.mulf %152, %152 : vector<8x128xf32>
    %154 = arith.mulf %152, %153 : vector<8x128xf32>
    %cst_50 = arith.constant 4.471500e-02 : f32
    %155 = vector.broadcast %cst_50 : f32 to vector<8x128xf32>
    %156 = arith.mulf %155, %154 : vector<8x128xf32>
    %157 = arith.addf %152, %156 : vector<8x128xf32>
    %cst_51 = arith.constant 0.797884583 : f32
    %158 = vector.broadcast %cst_51 : f32 to vector<8x128xf32>
    %159 = arith.mulf %158, %157 : vector<8x128xf32>
    %160 = math.tanh %159 : vector<8x128xf32>
    %cst_52 = arith.constant 1.000000e+00 : f32
    %161 = vector.broadcast %cst_52 : f32 to vector<8x128xf32>
    %162 = arith.addf %161, %160 : vector<8x128xf32>
    %cst_53 = arith.constant 5.000000e-01 : f32
    %163 = vector.broadcast %cst_53 : f32 to vector<8x128xf32>
    %164 = arith.mulf %163, %162 : vector<8x128xf32>
    %165 = arith.mulf %152, %164 : vector<8x128xf32>
    %166 = arith.truncf %165 : vector<8x128xf32> to vector<8x128xbf16>
    %c0_54 = arith.constant 0 : index
    %c0_55 = arith.constant 0 : index
    %167 = vector.load %arg11[%c0_54, %c0_55] : memref<128x128xbf16, #tpu.memory_space<vmem>>, vector<128x128xbf16>
    %cst_56 = arith.constant dense<0.000000e+00> : vector<8x128xf32>
    %168 = tpu.matmul %166, %167, %cst_56 {dimension_numbers = #tpu.dot_dimension_numbers<[1], [0], [0], [1], [0, 0, 1, 1], [], []>} : vector<8x128xbf16>, vector<128x128xbf16>, vector<8x128xf32> -> vector<8x128xf32>
    %c0_57 = arith.constant 0 : index
    %c0_58 = arith.constant 0 : index
    %169 = vector.load %arg12[%c0_57, %c0_58] : memref<1x128xf32, #tpu.memory_space<vmem>>, vector<1x128xf32>
    %170 = vector.broadcast %169 : vector<1x128xf32> to vector<8x128xf32>
    %171 = arith.addf %168, %170 : vector<8x128xf32>
    %172 = arith.addf %146, %171 : vector<8x128xf32>
    %c0_59 = arith.constant 0 : index
    %c0_60 = arith.constant 0 : index
    %173 = vector.load %arg13[%c0_59, %c0_60] : memref<1x128xf32, #tpu.memory_space<vmem>>, vector<1x128xf32>
    %c0_61 = arith.constant 0 : index
    %c0_62 = arith.constant 0 : index
    %174 = vector.load %arg14[%c0_61, %c0_62] : memref<1x128xf32, #tpu.memory_space<vmem>>, vector<1x128xf32>
    %cst_63 = arith.constant dense<0.000000e+00> : vector<8xf32>
    %175 = vector.multi_reduction <add>, %172, %cst_63 [1] : vector<8x128xf32> to vector<8xf32>
    %176 = vector.shape_cast %175 : vector<8xf32> to vector<8x1xf32>
    %cst_64 = arith.constant 3.125000e-02 : f32
    %177 = vector.broadcast %cst_64 : f32 to vector<8x1xf32>
    %178 = arith.mulf %176, %177 : vector<8x1xf32>
    %179 = vector.broadcast %178 : vector<8x1xf32> to vector<8x128xf32>
    %180 = arith.subf %172, %179 : vector<8x128xf32>
    %181 = vector.broadcast %4 : vector<1x128xf32> to vector<8x128xf32>
    %182 = arith.mulf %180, %181 : vector<8x128xf32>
    %183 = arith.mulf %182, %182 : vector<8x128xf32>
    %cst_65 = arith.constant dense<0.000000e+00> : vector<8xf32>
    %184 = vector.multi_reduction <add>, %183, %cst_65 [1] : vector<8x128xf32> to vector<8xf32>
    %185 = vector.shape_cast %184 : vector<8xf32> to vector<8x1xf32>
    %cst_66 = arith.constant 3.125000e-02 : f32
    %186 = vector.broadcast %cst_66 : f32 to vector<8x1xf32>
    %187 = arith.mulf %185, %186 : vector<8x1xf32>
    %cst_67 = arith.constant 9.99999996E-13 : f32
    %188 = vector.broadcast %cst_67 : f32 to vector<8x1xf32>
    %189 = arith.addf %187, %188 : vector<8x1xf32>
    %190 = math.rsqrt %189 : vector<8x1xf32>
    %191 = vector.broadcast %190 : vector<8x1xf32> to vector<8x128xf32>
    %192 = arith.mulf %182, %191 : vector<8x128xf32>
    %193 = vector.broadcast %173 : vector<1x128xf32> to vector<8x128xf32>
    %194 = arith.mulf %192, %193 : vector<8x128xf32>
    %195 = vector.broadcast %174 : vector<1x128xf32> to vector<8x128xf32>
    %196 = arith.addf %194, %195 : vector<8x128xf32>
    %c0_68 = arith.constant 0 : index
    %c0_69 = arith.constant 0 : index
    %197 = vector.load %arg17[%c0_68, %c0_69] : memref<8x128xf32, #tpu.memory_space<vmem>>, vector<8x128xf32>
    tpu.vector_store %arg17[%c0_68, %c0_69], %196 {strides = array<i32>} : memref<8x128xf32, #tpu.memory_space<vmem>>, vector<8x128xf32>,
    %198 = arith.truncf %196 : vector<8x128xf32> to vector<8x128xbf16>
    %c0_70 = arith.constant 0 : index
    %c0_71 = arith.constant 0 : index
    %199 = vector.load %arg15[%c0_70, %c0_71] : memref<128x128xbf16, #tpu.memory_space<vmem>>, vector<128x128xbf16>
    %cst_72 = arith.constant dense<0.000000e+00> : vector<8x128xf32>
    %200 = tpu.matmul %198, %199, %cst_72 {dimension_numbers = #tpu.dot_dimension_numbers<[1], [0], [0], [1], [0, 0, 1, 1], [], []>} : vector<8x128xbf16>, vector<128x128xbf16>, vector<8x128xf32> -> vector<8x128xf32>
    %c0_73 = arith.constant 0 : index
    %c0_74 = arith.constant 0 : index
    %201 = vector.load %arg16[%c0_73, %c0_74] : memref<1x128xf32, #tpu.memory_space<vmem>>, vector<1x128xf32>
    %202 = vector.broadcast %201 : vector<1x128xf32> to vector<8x128xf32>
    %203 = arith.addf %200, %202 : vector<8x128xf32>
    %c0_75 = arith.constant 0 : index
    %c0_76 = arith.constant 0 : index
    %204 = vector.load %arg18[%c0_75, %c0_76] : memref<8x128xf32, #tpu.memory_space<vmem>>, vector<8x128xf32>
    tpu.vector_store %arg18[%c0_75, %c0_76], %203 {strides = array<i32>} : memref<8x128xf32, #tpu.memory_space<vmem>>, vector<8x128xf32>,
    return
  }
  func.func @transform_0(%arg0: i32) -> (i32, i32) {
    %c0_i32 = arith.constant 0 : i32
    %c0_i32_0 = arith.constant 0 : i32
    return %arg0, %c0_i32 : i32, i32
  }
  func.func @transform_1(%arg0: i32) -> (i32, i32) {
    %c0_i32 = arith.constant 0 : i32
    %c0_i32_0 = arith.constant 0 : i32
    %c0_i32_1 = arith.constant 0 : i32
    return %c0_i32, %c0_i32_0 : i32, i32
  }
  func.func @transform_2(%arg0: i32) -> (i32, i32) {
    %c0_i32 = arith.constant 0 : i32
    %c0_i32_0 = arith.constant 0 : i32
    %c0_i32_1 = arith.constant 0 : i32
    return %c0_i32, %c0_i32_0 : i32, i32
  }
  func.func @transform_3(%arg0: i32) -> (i32, i32) {
    %c0_i32 = arith.constant 0 : i32
    %c0_i32_0 = arith.constant 0 : i32
    %c0_i32_1 = arith.constant 0 : i32
    return %c0_i32, %c0_i32_0 : i32, i32
  }
  func.func @transform_4(%arg0: i32) -> (i32, i32) {
    %c0_i32 = arith.constant 0 : i32
    %c0_i32_0 = arith.constant 0 : i32
    %c0_i32_1 = arith.constant 0 : i32
    return %c0_i32, %c0_i32_0 : i32, i32
  }
  func.func @transform_5(%arg0: i32) -> (i32, i32) {
    %c0_i32 = arith.constant 0 : i32
    %c0_i32_0 = arith.constant 0 : i32
    %c0_i32_1 = arith.constant 0 : i32
    return %c0_i32, %c0_i32_0 : i32, i32
  }
  func.func @transform_6(%arg0: i32) -> (i32, i32) {
    %c0_i32 = arith.constant 0 : i32
    %c0_i32_0 = arith.constant 0 : i32
    %c0_i32_1 = arith.constant 0 : i32
    return %c0_i32, %c0_i32_0 : i32, i32
  }
  func.func @transform_7(%arg0: i32) -> (i32, i32) {
    %c0_i32 = arith.constant 0 : i32
    %c0_i32_0 = arith.constant 0 : i32
    %c0_i32_1 = arith.constant 0 : i32
    return %c0_i32, %c0_i32_0 : i32, i32
  }
  func.func @transform_8(%arg0: i32) -> (i32, i32) {
    %c0_i32 = arith.constant 0 : i32
    %c0_i32_0 = arith.constant 0 : i32
    %c0_i32_1 = arith.constant 0 : i32
    return %c0_i32, %c0_i32_0 : i32, i32
  }
  func.func @transform_9(%arg0: i32) -> (i32, i32) {
    %c0_i32 = arith.constant 0 : i32
    %c0_i32_0 = arith.constant 0 : i32
    %c0_i32_1 = arith.constant 0 : i32
    return %c0_i32, %c0_i32_0 : i32, i32
  }
  func.func @transform_10(%arg0: i32) -> (i32, i32) {
    %c0_i32 = arith.constant 0 : i32
    %c0_i32_0 = arith.constant 0 : i32
    %c0_i32_1 = arith.constant 0 : i32
    return %c0_i32, %c0_i32_0 : i32, i32
  }
  func.func @transform_11(%arg0: i32) -> (i32, i32) {
    %c0_i32 = arith.constant 0 : i32
    %c0_i32_0 = arith.constant 0 : i32
    %c0_i32_1 = arith.constant 0 : i32
    return %c0_i32, %c0_i32_0 : i32, i32
  }
  func.func @transform_12(%arg0: i32) -> (i32, i32) {
    %c0_i32 = arith.constant 0 : i32
    %c0_i32_0 = arith.constant 0 : i32
    %c0_i32_1 = arith.constant 0 : i32
    return %c0_i32, %c0_i32_0 : i32, i32
  }
  func.func @transform_13(%arg0: i32) -> (i32, i32) {
    %c0_i32 = arith.constant 0 : i32
    %c0_i32_0 = arith.constant 0 : i32
    %c0_i32_1 = arith.constant 0 : i32
    return %c0_i32, %c0_i32_0 : i32, i32
  }
  func.func @transform_14(%arg0: i32) -> (i32, i32) {
    %c0_i32 = arith.constant 0 : i32
    %c0_i32_0 = arith.constant 0 : i32
    %c0_i32_1 = arith.constant 0 : i32
    return %c0_i32, %c0_i32_0 : i32, i32
  }
  func.func @transform_15(%arg0: i32) -> (i32, i32) {
    %c0_i32 = arith.constant 0 : i32
    %c0_i32_0 = arith.constant 0 : i32
    %c0_i32_1 = arith.constant 0 : i32
    return %c0_i32, %c0_i32_0 : i32, i32
  }
  func.func @transform_16(%arg0: i32) -> (i32, i32) {
    %c0_i32 = arith.constant 0 : i32
    %c0_i32_0 = arith.constant 0 : i32
    return %arg0, %c0_i32 : i32, i32
  }
  func.func @transform_17(%arg0: i32) -> (i32, i32) {
    %c0_i32 = arith.constant 0 : i32
    %c0_i32_0 = arith.constant 0 : i32
    return %arg0, %c0_i32 : i32, i32
  }
}

module attributes {stable_mosaic.version = 11 : i64} {
  func.func @_layer_kernel(%arg0: i32, %arg1: memref<8x128xf32, #tpu.memory_space<vmem>>, %arg2: memref<2x8xf32, #tpu.memory_space<vmem>>, %arg3: memref<1x128xf32, #tpu.memory_space<vmem>>, %arg4: memref<1x128xf32, #tpu.memory_space<vmem>>, %arg5: memref<96x128xbf16, #tpu.memory_space<vmem>>, %arg6: memref<96x1xf32, #tpu.memory_space<vmem>>, %arg7: memref<32x128xbf16, #tpu.memory_space<vmem>>, %arg8: memref<1x128xf32, #tpu.memory_space<vmem>>, %arg9: memref<1x128xf32, #tpu.memory_space<vmem>>, %arg10: memref<1x128xf32, #tpu.memory_space<vmem>>, %arg11: memref<128x128xbf16, #tpu.memory_space<vmem>>, %arg12: memref<1x128xf32, #tpu.memory_space<vmem>>, %arg13: memref<128x128xbf16, #tpu.memory_space<vmem>>, %arg14: memref<1x128xf32, #tpu.memory_space<vmem>>, %arg15: memref<1x128xf32, #tpu.memory_space<vmem>>, %arg16: memref<1x128xf32, #tpu.memory_space<vmem>>, %arg17: memref<8x128xf32, #tpu.memory_space<vmem>>) attributes {dimension_semantics = [#tpu.dimension_semantics<parallel>], iteration_bounds = array<i64: 2>, scalar_prefetch = 0 : i64, scratch_operands = 0 : i64, tpu.core_type = #tpu.core_type<tc>, window_params = [{transform_indices = @transform_0, window_bounds = array<i64: 8, 128>}, {pipeline_mode = #tpu.pipeline_mode<synchronous>, transform_indices = @transform_1, window_bounds = array<i64: 2, 8>}, {pipeline_mode = #tpu.pipeline_mode<synchronous>, transform_indices = @transform_2, window_bounds = array<i64: 1, 128>}, {pipeline_mode = #tpu.pipeline_mode<synchronous>, transform_indices = @transform_3, window_bounds = array<i64: 1, 128>}, {pipeline_mode = #tpu.pipeline_mode<synchronous>, transform_indices = @transform_4, window_bounds = array<i64: 96, 128>}, {pipeline_mode = #tpu.pipeline_mode<synchronous>, transform_indices = @transform_5, window_bounds = array<i64: 96, 1>}, {pipeline_mode = #tpu.pipeline_mode<synchronous>, transform_indices = @transform_6, window_bounds = array<i64: 32, 128>}, {pipeline_mode = #tpu.pipeline_mode<synchronous>, transform_indices = @transform_7, window_bounds = array<i64: 1, 128>}, {pipeline_mode = #tpu.pipeline_mode<synchronous>, transform_indices = @transform_8, window_bounds = array<i64: 1, 128>}, {pipeline_mode = #tpu.pipeline_mode<synchronous>, transform_indices = @transform_9, window_bounds = array<i64: 1, 128>}, {pipeline_mode = #tpu.pipeline_mode<synchronous>, transform_indices = @transform_10, window_bounds = array<i64: 128, 128>}, {pipeline_mode = #tpu.pipeline_mode<synchronous>, transform_indices = @transform_11, window_bounds = array<i64: 1, 128>}, {pipeline_mode = #tpu.pipeline_mode<synchronous>, transform_indices = @transform_12, window_bounds = array<i64: 128, 128>}, {pipeline_mode = #tpu.pipeline_mode<synchronous>, transform_indices = @transform_13, window_bounds = array<i64: 1, 128>}, {pipeline_mode = #tpu.pipeline_mode<synchronous>, transform_indices = @transform_14, window_bounds = array<i64: 1, 128>}, {pipeline_mode = #tpu.pipeline_mode<synchronous>, transform_indices = @transform_15, window_bounds = array<i64: 1, 128>}, {transform_indices = @transform_16, window_bounds = array<i64: 8, 128>}]} {
    %0 = tpu.iota {dimensions = array<i32: 1>} : vector<1x128xi32>
    %c32_i32 = arith.constant 32 : i32
    %1 = vector.broadcast %c32_i32 : i32 to vector<1x128xi32>
    %2 = arith.cmpi slt, %0, %1 : vector<1x128xi32>
    %3 = arith.extui %2 : vector<1x128xi1> to vector<1x128xi32>
    %4 = arith.sitofp %3 : vector<1x128xi32> to vector<1x128xf32>
    %c0 = arith.constant 0 : index
    %c0_0 = arith.constant 0 : index
    %5 = vector.load %arg1[%c0, %c0_0] : memref<8x128xf32, #tpu.memory_space<vmem>>, vector<8x128xf32>
    %c0_1 = arith.constant 0 : index
    %c0_2 = arith.constant 0 : index
    %6 = vector.load %arg3[%c0_1, %c0_2] : memref<1x128xf32, #tpu.memory_space<vmem>>, vector<1x128xf32>
    %c0_3 = arith.constant 0 : index
    %c0_4 = arith.constant 0 : index
    %7 = vector.load %arg4[%c0_3, %c0_4] : memref<1x128xf32, #tpu.memory_space<vmem>>, vector<1x128xf32>
    %cst = arith.constant dense<0.000000e+00> : vector<8xf32>
    %8 = vector.multi_reduction <add>, %5, %cst [1] : vector<8x128xf32> to vector<8xf32>
    %9 = vector.shape_cast %8 : vector<8xf32> to vector<8x1xf32>
    %cst_5 = arith.constant 3.125000e-02 : f32
    %10 = vector.broadcast %cst_5 : f32 to vector<8x1xf32>
    %11 = arith.mulf %9, %10 : vector<8x1xf32>
    %12 = vector.broadcast %11 : vector<8x1xf32> to vector<8x128xf32>
    %13 = arith.subf %5, %12 : vector<8x128xf32>
    %14 = vector.broadcast %4 : vector<1x128xf32> to vector<8x128xf32>
    %15 = arith.mulf %13, %14 : vector<8x128xf32>
    %16 = arith.mulf %15, %15 : vector<8x128xf32>
    %cst_6 = arith.constant dense<0.000000e+00> : vector<8xf32>
    %17 = vector.multi_reduction <add>, %16, %cst_6 [1] : vector<8x128xf32> to vector<8xf32>
    %18 = vector.shape_cast %17 : vector<8xf32> to vector<8x1xf32>
    %cst_7 = arith.constant 3.125000e-02 : f32
    %19 = vector.broadcast %cst_7 : f32 to vector<8x1xf32>
    %20 = arith.mulf %18, %19 : vector<8x1xf32>
    %cst_8 = arith.constant 9.99999996E-13 : f32
    %21 = vector.broadcast %cst_8 : f32 to vector<8x1xf32>
    %22 = arith.addf %20, %21 : vector<8x1xf32>
    %23 = math.rsqrt %22 : vector<8x1xf32>
    %24 = vector.broadcast %23 : vector<8x1xf32> to vector<8x128xf32>
    %25 = arith.mulf %15, %24 : vector<8x128xf32>
    %26 = vector.broadcast %6 : vector<1x128xf32> to vector<8x128xf32>
    %27 = arith.mulf %25, %26 : vector<8x128xf32>
    %28 = vector.broadcast %7 : vector<1x128xf32> to vector<8x128xf32>
    %29 = arith.addf %27, %28 : vector<8x128xf32>
    %30 = arith.index_cast %arg0 : i32 to index
    %c0_9 = arith.constant 0 : index
    %31 = vector.load %arg2[%30, %c0_9] : memref<2x8xf32, #tpu.memory_space<vmem>>, vector<1x8xf32>
    %cst_10 = arith.constant 1.000000e+00 : f32
    %32 = vector.broadcast %cst_10 : f32 to vector<1x8xf32>
    %33 = arith.subf %32, %31 : vector<1x8xf32>
    %cst_11 = arith.constant -1.000000e+09 : f32
    %34 = vector.broadcast %cst_11 : f32 to vector<1x8xf32>
    %35 = arith.mulf %33, %34 : vector<1x8xf32>
    %36 = arith.truncf %29 : vector<8x128xf32> to vector<8x128xbf16>
    %c0_12 = arith.constant 0 : index
    %c0_13 = arith.constant 0 : index
    %37 = vector.load %arg5[%c0_12, %c0_13] : memref<96x128xbf16, #tpu.memory_space<vmem>>, vector<96x128xbf16>
    %cst_14 = arith.constant dense<0.000000e+00> : vector<96x8xf32>
    %38 = tpu.matmul %37, %36, %cst_14 {dimension_numbers = #tpu.dot_dimension_numbers<[1], [1], [0], [0], [0, 0, 1, 0], [], []>} : vector<96x128xbf16>, vector<8x128xbf16>, vector<96x8xf32> -> vector<96x8xf32>
    %c0_15 = arith.constant 0 : index
    %c0_16 = arith.constant 0 : index
    %39 = vector.load %arg6[%c0_15, %c0_16] : memref<96x1xf32, #tpu.memory_space<vmem>>, vector<96x1xf32>
    %40 = vector.broadcast %39 : vector<96x1xf32> to vector<96x8xf32>
    %41 = arith.addf %38, %40 : vector<96x8xf32>
    %cst_17 = arith.constant 0.000000e+00 : f32
    %42 = vector.broadcast %cst_17 : f32 to vector<8x128xf32>
    %43 = vector.extract_strided_slice %41 {offsets = [0, 0], sizes = [8, 8], strides = [1, 1]} : vector<96x8xf32> to vector<8x8xf32>
    %44 = arith.truncf %43 : vector<8x8xf32> to vector<8x8xbf16>
    %45 = vector.extract_strided_slice %41 {offsets = [32, 0], sizes = [8, 8], strides = [1, 1]} : vector<96x8xf32> to vector<8x8xf32>
    %46 = arith.truncf %45 : vector<8x8xf32> to vector<8x8xbf16>
    %47 = vector.extract_strided_slice %41 {offsets = [64, 0], sizes = [8, 8], strides = [1, 1]} : vector<96x8xf32> to vector<8x8xf32>
    %48 = arith.truncf %47 : vector<8x8xf32> to vector<8x8xbf16>
    %cst_18 = arith.constant dense<0.000000e+00> : vector<8x8xf32>
    %49 = tpu.matmul %44, %46, %cst_18 {dimension_numbers = #tpu.dot_dimension_numbers<[0], [0], [1], [1], [0, 1, 1, 1], [], []>} : vector<8x8xbf16>, vector<8x8xbf16>, vector<8x8xf32> -> vector<8x8xf32>
    %50 = vector.broadcast %35 : vector<1x8xf32> to vector<8x8xf32>
    %51 = arith.addf %49, %50 : vector<8x8xf32>
    %cst_19 = arith.constant dense<0xFF800000> : vector<8xf32>
    %52 = vector.multi_reduction <maximumf>, %51, %cst_19 [1] : vector<8x8xf32> to vector<8xf32>
    %53 = vector.shape_cast %52 : vector<8xf32> to vector<8x1xf32>
    %54 = vector.broadcast %53 : vector<8x1xf32> to vector<8x8xf32>
    %55 = arith.subf %51, %54 : vector<8x8xf32>
    %56 = math.exp %55 : vector<8x8xf32>
    %cst_20 = arith.constant dense<0.000000e+00> : vector<8xf32>
    %57 = vector.multi_reduction <add>, %56, %cst_20 [1] : vector<8x8xf32> to vector<8xf32>
    %58 = vector.shape_cast %57 : vector<8xf32> to vector<8x1xf32>
    %59 = tpu.reciprocal %58 {approx = true} : vector<8x1xf32> -> vector<8x1xf32>
    %60 = vector.broadcast %59 : vector<8x1xf32> to vector<8x8xf32>
    %61 = arith.mulf %56, %60 : vector<8x8xf32>
    %62 = arith.truncf %61 : vector<8x8xf32> to vector<8x8xbf16>
    %cst_21 = arith.constant dense<0.000000e+00> : vector<8x8xf32>
    %63 = tpu.matmul %48, %62, %cst_21 {dimension_numbers = #tpu.dot_dimension_numbers<[1], [1], [0], [0], [0, 0, 1, 0], [], []>} : vector<8x8xbf16>, vector<8x8xbf16>, vector<8x8xf32> -> vector<8x8xf32>
    %64 = arith.truncf %63 : vector<8x8xf32> to vector<8x8xbf16>
    %c0_22 = arith.constant 0 : index
    %c0_23 = arith.constant 0 : index
    %65 = vector.load %arg7[%c0_22, %c0_23] : memref<32x128xbf16, #tpu.memory_space<vmem>>, vector<8x128xbf16>
    %cst_24 = arith.constant dense<0.000000e+00> : vector<8x128xf32>
    %66 = tpu.matmul %64, %65, %cst_24 {dimension_numbers = #tpu.dot_dimension_numbers<[0], [0], [1], [1], [0, 1, 1, 1], [], []>} : vector<8x8xbf16>, vector<8x128xbf16>, vector<8x128xf32> -> vector<8x128xf32>
    %67 = arith.addf %42, %66 : vector<8x128xf32>
    %68 = vector.extract_strided_slice %41 {offsets = [8, 0], sizes = [8, 8], strides = [1, 1]} : vector<96x8xf32> to vector<8x8xf32>
    %69 = arith.truncf %68 : vector<8x8xf32> to vector<8x8xbf16>
    %70 = vector.extract_strided_slice %41 {offsets = [40, 0], sizes = [8, 8], strides = [1, 1]} : vector<96x8xf32> to vector<8x8xf32>
    %71 = arith.truncf %70 : vector<8x8xf32> to vector<8x8xbf16>
    %72 = vector.extract_strided_slice %41 {offsets = [72, 0], sizes = [8, 8], strides = [1, 1]} : vector<96x8xf32> to vector<8x8xf32>
    %73 = arith.truncf %72 : vector<8x8xf32> to vector<8x8xbf16>
    %cst_25 = arith.constant dense<0.000000e+00> : vector<8x8xf32>
    %74 = tpu.matmul %69, %71, %cst_25 {dimension_numbers = #tpu.dot_dimension_numbers<[0], [0], [1], [1], [0, 1, 1, 1], [], []>} : vector<8x8xbf16>, vector<8x8xbf16>, vector<8x8xf32> -> vector<8x8xf32>
    %75 = vector.broadcast %35 : vector<1x8xf32> to vector<8x8xf32>
    %76 = arith.addf %74, %75 : vector<8x8xf32>
    %cst_26 = arith.constant dense<0xFF800000> : vector<8xf32>
    %77 = vector.multi_reduction <maximumf>, %76, %cst_26 [1] : vector<8x8xf32> to vector<8xf32>
    %78 = vector.shape_cast %77 : vector<8xf32> to vector<8x1xf32>
    %79 = vector.broadcast %78 : vector<8x1xf32> to vector<8x8xf32>
    %80 = arith.subf %76, %79 : vector<8x8xf32>
    %81 = math.exp %80 : vector<8x8xf32>
    %cst_27 = arith.constant dense<0.000000e+00> : vector<8xf32>
    %82 = vector.multi_reduction <add>, %81, %cst_27 [1] : vector<8x8xf32> to vector<8xf32>
    %83 = vector.shape_cast %82 : vector<8xf32> to vector<8x1xf32>
    %84 = tpu.reciprocal %83 {approx = true} : vector<8x1xf32> -> vector<8x1xf32>
    %85 = vector.broadcast %84 : vector<8x1xf32> to vector<8x8xf32>
    %86 = arith.mulf %81, %85 : vector<8x8xf32>
    %87 = arith.truncf %86 : vector<8x8xf32> to vector<8x8xbf16>
    %cst_28 = arith.constant dense<0.000000e+00> : vector<8x8xf32>
    %88 = tpu.matmul %73, %87, %cst_28 {dimension_numbers = #tpu.dot_dimension_numbers<[1], [1], [0], [0], [0, 0, 1, 0], [], []>} : vector<8x8xbf16>, vector<8x8xbf16>, vector<8x8xf32> -> vector<8x8xf32>
    %89 = arith.truncf %88 : vector<8x8xf32> to vector<8x8xbf16>
    %c8 = arith.constant 8 : index
    %c0_29 = arith.constant 0 : index
    %90 = vector.load %arg7[%c8, %c0_29] : memref<32x128xbf16, #tpu.memory_space<vmem>>, vector<8x128xbf16>
    %cst_30 = arith.constant dense<0.000000e+00> : vector<8x128xf32>
    %91 = tpu.matmul %89, %90, %cst_30 {dimension_numbers = #tpu.dot_dimension_numbers<[0], [0], [1], [1], [0, 1, 1, 1], [], []>} : vector<8x8xbf16>, vector<8x128xbf16>, vector<8x128xf32> -> vector<8x128xf32>
    %92 = arith.addf %67, %91 : vector<8x128xf32>
    %93 = vector.extract_strided_slice %41 {offsets = [16, 0], sizes = [8, 8], strides = [1, 1]} : vector<96x8xf32> to vector<8x8xf32>
    %94 = arith.truncf %93 : vector<8x8xf32> to vector<8x8xbf16>
    %95 = vector.extract_strided_slice %41 {offsets = [48, 0], sizes = [8, 8], strides = [1, 1]} : vector<96x8xf32> to vector<8x8xf32>
    %96 = arith.truncf %95 : vector<8x8xf32> to vector<8x8xbf16>
    %97 = vector.extract_strided_slice %41 {offsets = [80, 0], sizes = [8, 8], strides = [1, 1]} : vector<96x8xf32> to vector<8x8xf32>
    %98 = arith.truncf %97 : vector<8x8xf32> to vector<8x8xbf16>
    %cst_31 = arith.constant dense<0.000000e+00> : vector<8x8xf32>
    %99 = tpu.matmul %94, %96, %cst_31 {dimension_numbers = #tpu.dot_dimension_numbers<[0], [0], [1], [1], [0, 1, 1, 1], [], []>} : vector<8x8xbf16>, vector<8x8xbf16>, vector<8x8xf32> -> vector<8x8xf32>
    %100 = vector.broadcast %35 : vector<1x8xf32> to vector<8x8xf32>
    %101 = arith.addf %99, %100 : vector<8x8xf32>
    %cst_32 = arith.constant dense<0xFF800000> : vector<8xf32>
    %102 = vector.multi_reduction <maximumf>, %101, %cst_32 [1] : vector<8x8xf32> to vector<8xf32>
    %103 = vector.shape_cast %102 : vector<8xf32> to vector<8x1xf32>
    %104 = vector.broadcast %103 : vector<8x1xf32> to vector<8x8xf32>
    %105 = arith.subf %101, %104 : vector<8x8xf32>
    %106 = math.exp %105 : vector<8x8xf32>
    %cst_33 = arith.constant dense<0.000000e+00> : vector<8xf32>
    %107 = vector.multi_reduction <add>, %106, %cst_33 [1] : vector<8x8xf32> to vector<8xf32>
    %108 = vector.shape_cast %107 : vector<8xf32> to vector<8x1xf32>
    %109 = tpu.reciprocal %108 {approx = true} : vector<8x1xf32> -> vector<8x1xf32>
    %110 = vector.broadcast %109 : vector<8x1xf32> to vector<8x8xf32>
    %111 = arith.mulf %106, %110 : vector<8x8xf32>
    %112 = arith.truncf %111 : vector<8x8xf32> to vector<8x8xbf16>
    %cst_34 = arith.constant dense<0.000000e+00> : vector<8x8xf32>
    %113 = tpu.matmul %98, %112, %cst_34 {dimension_numbers = #tpu.dot_dimension_numbers<[1], [1], [0], [0], [0, 0, 1, 0], [], []>} : vector<8x8xbf16>, vector<8x8xbf16>, vector<8x8xf32> -> vector<8x8xf32>
    %114 = arith.truncf %113 : vector<8x8xf32> to vector<8x8xbf16>
    %c16 = arith.constant 16 : index
    %c0_35 = arith.constant 0 : index
    %115 = vector.load %arg7[%c16, %c0_35] : memref<32x128xbf16, #tpu.memory_space<vmem>>, vector<8x128xbf16>
    %cst_36 = arith.constant dense<0.000000e+00> : vector<8x128xf32>
    %116 = tpu.matmul %114, %115, %cst_36 {dimension_numbers = #tpu.dot_dimension_numbers<[0], [0], [1], [1], [0, 1, 1, 1], [], []>} : vector<8x8xbf16>, vector<8x128xbf16>, vector<8x128xf32> -> vector<8x128xf32>
    %117 = arith.addf %92, %116 : vector<8x128xf32>
    %118 = vector.extract_strided_slice %41 {offsets = [24, 0], sizes = [8, 8], strides = [1, 1]} : vector<96x8xf32> to vector<8x8xf32>
    %119 = arith.truncf %118 : vector<8x8xf32> to vector<8x8xbf16>
    %120 = vector.extract_strided_slice %41 {offsets = [56, 0], sizes = [8, 8], strides = [1, 1]} : vector<96x8xf32> to vector<8x8xf32>
    %121 = arith.truncf %120 : vector<8x8xf32> to vector<8x8xbf16>
    %122 = vector.extract_strided_slice %41 {offsets = [88, 0], sizes = [8, 8], strides = [1, 1]} : vector<96x8xf32> to vector<8x8xf32>
    %123 = arith.truncf %122 : vector<8x8xf32> to vector<8x8xbf16>
    %cst_37 = arith.constant dense<0.000000e+00> : vector<8x8xf32>
    %124 = tpu.matmul %119, %121, %cst_37 {dimension_numbers = #tpu.dot_dimension_numbers<[0], [0], [1], [1], [0, 1, 1, 1], [], []>} : vector<8x8xbf16>, vector<8x8xbf16>, vector<8x8xf32> -> vector<8x8xf32>
    %125 = vector.broadcast %35 : vector<1x8xf32> to vector<8x8xf32>
    %126 = arith.addf %124, %125 : vector<8x8xf32>
    %cst_38 = arith.constant dense<0xFF800000> : vector<8xf32>
    %127 = vector.multi_reduction <maximumf>, %126, %cst_38 [1] : vector<8x8xf32> to vector<8xf32>
    %128 = vector.shape_cast %127 : vector<8xf32> to vector<8x1xf32>
    %129 = vector.broadcast %128 : vector<8x1xf32> to vector<8x8xf32>
    %130 = arith.subf %126, %129 : vector<8x8xf32>
    %131 = math.exp %130 : vector<8x8xf32>
    %cst_39 = arith.constant dense<0.000000e+00> : vector<8xf32>
    %132 = vector.multi_reduction <add>, %131, %cst_39 [1] : vector<8x8xf32> to vector<8xf32>
    %133 = vector.shape_cast %132 : vector<8xf32> to vector<8x1xf32>
    %134 = tpu.reciprocal %133 {approx = true} : vector<8x1xf32> -> vector<8x1xf32>
    %135 = vector.broadcast %134 : vector<8x1xf32> to vector<8x8xf32>
    %136 = arith.mulf %131, %135 : vector<8x8xf32>
    %137 = arith.truncf %136 : vector<8x8xf32> to vector<8x8xbf16>
    %cst_40 = arith.constant dense<0.000000e+00> : vector<8x8xf32>
    %138 = tpu.matmul %123, %137, %cst_40 {dimension_numbers = #tpu.dot_dimension_numbers<[1], [1], [0], [0], [0, 0, 1, 0], [], []>} : vector<8x8xbf16>, vector<8x8xbf16>, vector<8x8xf32> -> vector<8x8xf32>
    %139 = arith.truncf %138 : vector<8x8xf32> to vector<8x8xbf16>
    %c24 = arith.constant 24 : index
    %c0_41 = arith.constant 0 : index
    %140 = vector.load %arg7[%c24, %c0_41] : memref<32x128xbf16, #tpu.memory_space<vmem>>, vector<8x128xbf16>
    %cst_42 = arith.constant dense<0.000000e+00> : vector<8x128xf32>
    %141 = tpu.matmul %139, %140, %cst_42 {dimension_numbers = #tpu.dot_dimension_numbers<[0], [0], [1], [1], [0, 1, 1, 1], [], []>} : vector<8x8xbf16>, vector<8x128xbf16>, vector<8x128xf32> -> vector<8x128xf32>
    %142 = arith.addf %117, %141 : vector<8x128xf32>
    %c0_43 = arith.constant 0 : index
    %c0_44 = arith.constant 0 : index
    %143 = vector.load %arg8[%c0_43, %c0_44] : memref<1x128xf32, #tpu.memory_space<vmem>>, vector<1x128xf32>
    %144 = vector.broadcast %143 : vector<1x128xf32> to vector<8x128xf32>
    %145 = arith.addf %142, %144 : vector<8x128xf32>
    %146 = arith.addf %29, %145 : vector<8x128xf32>
    %c0_45 = arith.constant 0 : index
    %c0_46 = arith.constant 0 : index
    %147 = vector.load %arg9[%c0_45, %c0_46] : memref<1x128xf32, #tpu.memory_space<vmem>>, vector<1x128xf32>
    %c0_47 = arith.constant 0 : index
    %c0_48 = arith.constant 0 : index
    %148 = vector.load %arg10[%c0_47, %c0_48] : memref<1x128xf32, #tpu.memory_space<vmem>>, vector<1x128xf32>
    %cst_49 = arith.constant dense<0.000000e+00> : vector<8xf32>
    %149 = vector.multi_reduction <add>, %146, %cst_49 [1] : vector<8x128xf32> to vector<8xf32>
    %150 = vector.shape_cast %149 : vector<8xf32> to vector<8x1xf32>
    %cst_50 = arith.constant 3.125000e-02 : f32
    %151 = vector.broadcast %cst_50 : f32 to vector<8x1xf32>
    %152 = arith.mulf %150, %151 : vector<8x1xf32>
    %153 = vector.broadcast %152 : vector<8x1xf32> to vector<8x128xf32>
    %154 = arith.subf %146, %153 : vector<8x128xf32>
    %155 = vector.broadcast %4 : vector<1x128xf32> to vector<8x128xf32>
    %156 = arith.mulf %154, %155 : vector<8x128xf32>
    %157 = arith.mulf %156, %156 : vector<8x128xf32>
    %cst_51 = arith.constant dense<0.000000e+00> : vector<8xf32>
    %158 = vector.multi_reduction <add>, %157, %cst_51 [1] : vector<8x128xf32> to vector<8xf32>
    %159 = vector.shape_cast %158 : vector<8xf32> to vector<8x1xf32>
    %cst_52 = arith.constant 3.125000e-02 : f32
    %160 = vector.broadcast %cst_52 : f32 to vector<8x1xf32>
    %161 = arith.mulf %159, %160 : vector<8x1xf32>
    %cst_53 = arith.constant 9.99999996E-13 : f32
    %162 = vector.broadcast %cst_53 : f32 to vector<8x1xf32>
    %163 = arith.addf %161, %162 : vector<8x1xf32>
    %164 = math.rsqrt %163 : vector<8x1xf32>
    %165 = vector.broadcast %164 : vector<8x1xf32> to vector<8x128xf32>
    %166 = arith.mulf %156, %165 : vector<8x128xf32>
    %167 = vector.broadcast %147 : vector<1x128xf32> to vector<8x128xf32>
    %168 = arith.mulf %166, %167 : vector<8x128xf32>
    %169 = vector.broadcast %148 : vector<1x128xf32> to vector<8x128xf32>
    %170 = arith.addf %168, %169 : vector<8x128xf32>
    %171 = arith.truncf %170 : vector<8x128xf32> to vector<8x128xbf16>
    %c0_54 = arith.constant 0 : index
    %c0_55 = arith.constant 0 : index
    %172 = vector.load %arg11[%c0_54, %c0_55] : memref<128x128xbf16, #tpu.memory_space<vmem>>, vector<128x128xbf16>
    %cst_56 = arith.constant dense<0.000000e+00> : vector<8x128xf32>
    %173 = tpu.matmul %171, %172, %cst_56 {dimension_numbers = #tpu.dot_dimension_numbers<[1], [0], [0], [1], [0, 0, 1, 1], [], []>} : vector<8x128xbf16>, vector<128x128xbf16>, vector<8x128xf32> -> vector<8x128xf32>
    %c0_57 = arith.constant 0 : index
    %c0_58 = arith.constant 0 : index
    %174 = vector.load %arg12[%c0_57, %c0_58] : memref<1x128xf32, #tpu.memory_space<vmem>>, vector<1x128xf32>
    %175 = vector.broadcast %174 : vector<1x128xf32> to vector<8x128xf32>
    %176 = arith.addf %173, %175 : vector<8x128xf32>
    %177 = arith.mulf %176, %176 : vector<8x128xf32>
    %178 = arith.mulf %176, %177 : vector<8x128xf32>
    %cst_59 = arith.constant 4.471500e-02 : f32
    %179 = vector.broadcast %cst_59 : f32 to vector<8x128xf32>
    %180 = arith.mulf %179, %178 : vector<8x128xf32>
    %181 = arith.addf %176, %180 : vector<8x128xf32>
    %cst_60 = arith.constant 0.797884583 : f32
    %182 = vector.broadcast %cst_60 : f32 to vector<8x128xf32>
    %183 = arith.mulf %182, %181 : vector<8x128xf32>
    %184 = math.tanh %183 : vector<8x128xf32>
    %cst_61 = arith.constant 1.000000e+00 : f32
    %185 = vector.broadcast %cst_61 : f32 to vector<8x128xf32>
    %186 = arith.addf %185, %184 : vector<8x128xf32>
    %cst_62 = arith.constant 5.000000e-01 : f32
    %187 = vector.broadcast %cst_62 : f32 to vector<8x128xf32>
    %188 = arith.mulf %187, %186 : vector<8x128xf32>
    %189 = arith.mulf %176, %188 : vector<8x128xf32>
    %190 = arith.truncf %189 : vector<8x128xf32> to vector<8x128xbf16>
    %c0_63 = arith.constant 0 : index
    %c0_64 = arith.constant 0 : index
    %191 = vector.load %arg13[%c0_63, %c0_64] : memref<128x128xbf16, #tpu.memory_space<vmem>>, vector<128x128xbf16>
    %cst_65 = arith.constant dense<0.000000e+00> : vector<8x128xf32>
    %192 = tpu.matmul %190, %191, %cst_65 {dimension_numbers = #tpu.dot_dimension_numbers<[1], [0], [0], [1], [0, 0, 1, 1], [], []>} : vector<8x128xbf16>, vector<128x128xbf16>, vector<8x128xf32> -> vector<8x128xf32>
    %c0_66 = arith.constant 0 : index
    %c0_67 = arith.constant 0 : index
    %193 = vector.load %arg14[%c0_66, %c0_67] : memref<1x128xf32, #tpu.memory_space<vmem>>, vector<1x128xf32>
    %194 = vector.broadcast %193 : vector<1x128xf32> to vector<8x128xf32>
    %195 = arith.addf %192, %194 : vector<8x128xf32>
    %196 = arith.addf %170, %195 : vector<8x128xf32>
    %c0_68 = arith.constant 0 : index
    %c0_69 = arith.constant 0 : index
    %197 = vector.load %arg15[%c0_68, %c0_69] : memref<1x128xf32, #tpu.memory_space<vmem>>, vector<1x128xf32>
    %c0_70 = arith.constant 0 : index
    %c0_71 = arith.constant 0 : index
    %198 = vector.load %arg16[%c0_70, %c0_71] : memref<1x128xf32, #tpu.memory_space<vmem>>, vector<1x128xf32>
    %cst_72 = arith.constant dense<0.000000e+00> : vector<8xf32>
    %199 = vector.multi_reduction <add>, %196, %cst_72 [1] : vector<8x128xf32> to vector<8xf32>
    %200 = vector.shape_cast %199 : vector<8xf32> to vector<8x1xf32>
    %cst_73 = arith.constant 3.125000e-02 : f32
    %201 = vector.broadcast %cst_73 : f32 to vector<8x1xf32>
    %202 = arith.mulf %200, %201 : vector<8x1xf32>
    %203 = vector.broadcast %202 : vector<8x1xf32> to vector<8x128xf32>
    %204 = arith.subf %196, %203 : vector<8x128xf32>
    %205 = vector.broadcast %4 : vector<1x128xf32> to vector<8x128xf32>
    %206 = arith.mulf %204, %205 : vector<8x128xf32>
    %207 = arith.mulf %206, %206 : vector<8x128xf32>
    %cst_74 = arith.constant dense<0.000000e+00> : vector<8xf32>
    %208 = vector.multi_reduction <add>, %207, %cst_74 [1] : vector<8x128xf32> to vector<8xf32>
    %209 = vector.shape_cast %208 : vector<8xf32> to vector<8x1xf32>
    %cst_75 = arith.constant 3.125000e-02 : f32
    %210 = vector.broadcast %cst_75 : f32 to vector<8x1xf32>
    %211 = arith.mulf %209, %210 : vector<8x1xf32>
    %cst_76 = arith.constant 9.99999996E-13 : f32
    %212 = vector.broadcast %cst_76 : f32 to vector<8x1xf32>
    %213 = arith.addf %211, %212 : vector<8x1xf32>
    %214 = math.rsqrt %213 : vector<8x1xf32>
    %215 = vector.broadcast %214 : vector<8x1xf32> to vector<8x128xf32>
    %216 = arith.mulf %206, %215 : vector<8x128xf32>
    %217 = vector.broadcast %197 : vector<1x128xf32> to vector<8x128xf32>
    %218 = arith.mulf %216, %217 : vector<8x128xf32>
    %219 = vector.broadcast %198 : vector<1x128xf32> to vector<8x128xf32>
    %220 = arith.addf %218, %219 : vector<8x128xf32>
    %c0_77 = arith.constant 0 : index
    %c0_78 = arith.constant 0 : index
    %221 = vector.load %arg17[%c0_77, %c0_78] : memref<8x128xf32, #tpu.memory_space<vmem>>, vector<8x128xf32>
    tpu.vector_store %arg17[%c0_77, %c0_78], %220 {strides = array<i32>} : memref<8x128xf32, #tpu.memory_space<vmem>>, vector<8x128xf32>,
    return
  }
  func.func @transform_0(%arg0: i32) -> (i32, i32) {
    %c0_i32 = arith.constant 0 : i32
    %c0_i32_0 = arith.constant 0 : i32
    return %arg0, %c0_i32 : i32, i32
  }
  func.func @transform_1(%arg0: i32) -> (i32, i32) {
    %c0_i32 = arith.constant 0 : i32
    %c0_i32_0 = arith.constant 0 : i32
    %c0_i32_1 = arith.constant 0 : i32
    return %c0_i32, %c0_i32_0 : i32, i32
  }
  func.func @transform_2(%arg0: i32) -> (i32, i32) {
    %c0_i32 = arith.constant 0 : i32
    %c0_i32_0 = arith.constant 0 : i32
    %c0_i32_1 = arith.constant 0 : i32
    return %c0_i32, %c0_i32_0 : i32, i32
  }
  func.func @transform_3(%arg0: i32) -> (i32, i32) {
    %c0_i32 = arith.constant 0 : i32
    %c0_i32_0 = arith.constant 0 : i32
    %c0_i32_1 = arith.constant 0 : i32
    return %c0_i32, %c0_i32_0 : i32, i32
  }
  func.func @transform_4(%arg0: i32) -> (i32, i32) {
    %c0_i32 = arith.constant 0 : i32
    %c0_i32_0 = arith.constant 0 : i32
    %c0_i32_1 = arith.constant 0 : i32
    return %c0_i32, %c0_i32_0 : i32, i32
  }
  func.func @transform_5(%arg0: i32) -> (i32, i32) {
    %c0_i32 = arith.constant 0 : i32
    %c0_i32_0 = arith.constant 0 : i32
    %c0_i32_1 = arith.constant 0 : i32
    return %c0_i32, %c0_i32_0 : i32, i32
  }
  func.func @transform_6(%arg0: i32) -> (i32, i32) {
    %c0_i32 = arith.constant 0 : i32
    %c0_i32_0 = arith.constant 0 : i32
    %c0_i32_1 = arith.constant 0 : i32
    return %c0_i32, %c0_i32_0 : i32, i32
  }
  func.func @transform_7(%arg0: i32) -> (i32, i32) {
    %c0_i32 = arith.constant 0 : i32
    %c0_i32_0 = arith.constant 0 : i32
    %c0_i32_1 = arith.constant 0 : i32
    return %c0_i32, %c0_i32_0 : i32, i32
  }
  func.func @transform_8(%arg0: i32) -> (i32, i32) {
    %c0_i32 = arith.constant 0 : i32
    %c0_i32_0 = arith.constant 0 : i32
    %c0_i32_1 = arith.constant 0 : i32
    return %c0_i32, %c0_i32_0 : i32, i32
  }
  func.func @transform_9(%arg0: i32) -> (i32, i32) {
    %c0_i32 = arith.constant 0 : i32
    %c0_i32_0 = arith.constant 0 : i32
    %c0_i32_1 = arith.constant 0 : i32
    return %c0_i32, %c0_i32_0 : i32, i32
  }
  func.func @transform_10(%arg0: i32) -> (i32, i32) {
    %c0_i32 = arith.constant 0 : i32
    %c0_i32_0 = arith.constant 0 : i32
    %c0_i32_1 = arith.constant 0 : i32
    return %c0_i32, %c0_i32_0 : i32, i32
  }
  func.func @transform_11(%arg0: i32) -> (i32, i32) {
    %c0_i32 = arith.constant 0 : i32
    %c0_i32_0 = arith.constant 0 : i32
    %c0_i32_1 = arith.constant 0 : i32
    return %c0_i32, %c0_i32_0 : i32, i32
  }
  func.func @transform_12(%arg0: i32) -> (i32, i32) {
    %c0_i32 = arith.constant 0 : i32
    %c0_i32_0 = arith.constant 0 : i32
    %c0_i32_1 = arith.constant 0 : i32
    return %c0_i32, %c0_i32_0 : i32, i32
  }
  func.func @transform_13(%arg0: i32) -> (i32, i32) {
    %c0_i32 = arith.constant 0 : i32
    %c0_i32_0 = arith.constant 0 : i32
    %c0_i32_1 = arith.constant 0 : i32
    return %c0_i32, %c0_i32_0 : i32, i32
  }
  func.func @transform_14(%arg0: i32) -> (i32, i32) {
    %c0_i32 = arith.constant 0 : i32
    %c0_i32_0 = arith.constant 0 : i32
    %c0_i32_1 = arith.constant 0 : i32
    return %c0_i32, %c0_i32_0 : i32, i32
  }
  func.func @transform_15(%arg0: i32) -> (i32, i32) {
    %c0_i32 = arith.constant 0 : i32
    %c0_i32_0 = arith.constant 0 : i32
    %c0_i32_1 = arith.constant 0 : i32
    return %c0_i32, %c0_i32_0 : i32, i32
  }
  func.func @transform_16(%arg0: i32) -> (i32, i32) {
    %c0_i32 = arith.constant 0 : i32
    %c0_i32_0 = arith.constant 0 : i32
    return %arg0, %c0_i32 : i32, i32
  }
}

</mosaic_0001>

<bundles_post_ra>
// kernel: distilbert_classifier.3
= control target key start
LH: loop header
LB: loop body
LE: loop exit
PB: predicated region body
PF: predicated region fallthrough
CT: control target
= control target key end

     0   :  { %s2975_s0 = inlined_call_operand.vmem [shape: f32[16,128], index: 0, kind: input, shape index: {}]   ;;  %s2976_s1 = inlined_call_operand.vmem [shape: f32[2,8], index: 1, kind: input, shape index: {}]   ;;  %s2977_s2 = inlined_call_operand.vmem [shape: bf16[96,128], index: 2, kind: input, shape index: {}]   ;;  %s2978_s3 = inlined_call_operand.vmem [shape: f32[96,1], index: 3, kind: input, shape index: {}]   ;;  %s2979_s4 = inlined_call_operand.vmem [shape: bf16[32,128], index: 4, kind: input, shape index: {}]   ;;  %s2980_s5 = inlined_call_operand.vmem [shape: f32[1,128], index: 5, kind: input, shape index: {}]   ;;  %s2981_s6 = inlined_call_operand.vmem [shape: f32[1,128], index: 6, kind: input, shape index: {}]   ;;  %s2982_s7 = inlined_call_operand.vmem [shape: f32[1,128], index: 7, kind: input, shape index: {}]   ;;  %s2983_s8 = inlined_call_operand.vmem [shape: bf16[128,128], index: 8, kind: input, shape index: {}]   ;;  %s2984_s9 = inlined_call_operand.vmem [shape: f32[1,128], index: 9, kind: input, shape index: {}]   ;;  %s2985_s10 = inlined_call_operand.vmem [shape: bf16[128,128], index: 10, kind: input, shape index: {}]   ;;  %s2986_s11 = inlined_call_operand.vmem [shape: f32[1,128], index: 11, kind: input, shape index: {}]   ;;  %s2987_s12 = inlined_call_operand.vmem [shape: f32[1,128], index: 12, kind: input, shape index: {}]   ;;  %s2988_s13 = inlined_call_operand.vmem [shape: f32[1,128], index: 13, kind: input, shape index: {}]   ;;  %s2989_s14 = inlined_call_operand.vmem [shape: bf16[128,128], index: 14, kind: input, shape index: {}]   ;;  %s2990_s15 = inlined_call_operand.vmem [shape: f32[1,128], index: 15, kind: input, shape index: {}]   ;;  %s2991_s16 = inlined_call_operand.hbm [shape: f32[16,128], index: 16, kind: output, shape index: {0}]   ;;  %s2992_s17 = inlined_call_operand.vmem [shape: f32[16,128], index: 17, kind: output, shape index: {1}]  }
   0x1   :  { %2998 = sst [smem:[#allocation9_spill]] %s2975_s0 }
   0x2   :  { %2999 = sst [smem:[#allocation10_spill]] %s2976_s1 }
   0x3   :  { %3000 = sst [smem:[#allocation11_spill]] %s2977_s2 }
   0x4   :  { %3001 = sst [smem:[#allocation12_spill]] %s2978_s3 }
   0x5   :  { %3002 = sst [smem:[#allocation13_spill]] %s2979_s4 }
   0x6   :  { %23 = vsyncpa [#allocation3], 0 }
   0x7   :  { %25 = vsyncpa [#allocation3 + $0x1], 0  ;;  %s2564_s24 = smov 0   ;;  %s2566_s25 = smov 0  }
   0x8   :  { %s2568_s26 = smov 0   ;;  %s2570_s27 = smov 0  }
   0x9 LB: > { %3003 = sst [smem:[#allocation5_spill]] %s2464_s26  ;;  %s2585_s28 = sadd.s32 4294967295, %s2468_s27   ;;  %s2468_s27 = sphi %s2570_s27, %s3016_s27   ;;  %s2464_s26 = sphi %s2568_s26, %s3018_s26   ;;  %s2460_s25 = sphi %s2566_s25, %s3020_s25   ;;  %s2456_s24 = sphi %s2564_s24, %s3019_s24  }
   0xa   : > { %s2042_s29 = sadd.s32 4294967294, %s2468_s27   ;;  %s2589_s0 = sadd.s32 1, %s2468_s27  }
   0xb   : > { %3004 = sst [smem:[#allocation6_spill]] %s2589_s0  ;;  %s379_s30 = sadd.s32 1, %s2464_s26 }
   0xc   : > { %s376_s18 = ssub.s32 %s2468_s27, %s2589_s0  ;;  %p389_p0 = scmp.ne.s32.totalorder %s2464_s26, %s2460_s25 }
   0xd   : > { %p377_p1 = scmp.eq.s32.totalorder %s376_s18, 0  ;;  %p390_p2 = scmp.eq.s32.totalorder %s2585_s28, 1 }
   0xe   : > { %p395_p3 = scmp.ne.s32.totalorder %s2460_s25, %s2456_s24  ;;  %p396_p4 = scmp.eq.s32.totalorder %s2042_s29, 1 }
   0xf   : > { %s2600_s19 = scalar_select %p377_p1, %s2464_s26, %s379_s30  }
  0x10   : > { %p2602_p5 = por %p390_p2, %p389_p0  ;;  %p2606_p6 = por %p396_p4, %p395_p3 }
  0x11   : > { %3005 = sst [smem:[#allocation7_spill]] %s2600_s19  ;;  %p2045_p7 = scmp.ge.s32.totalorder %s2468_s27, 1 }
  0x12   : > { %s3007_s20 = scalar_select %p2606_p6, 1, 0 }
  0x13   : > { %p492_p8 = scmp.lt.s32.totalorder %s2468_s27, 3 }
  0x14   : > { %3008 = sst [smem:[#allocation8_spill]] %s3007_s20 }
  0x15   : > { %p493_p9 = pnand %p2045_p7, %p492_p8 }
  0x16   : > { %p547_p10 = scmp.lt.s32.totalorder (!%p493_p9), %s2585_s28, 1  ;;  %s3009_s2 = sld [smem:[#allocation11_spill]] (!%p493_p9)  ;;  %v2470_v2 = vmov (!%p493_p9), 0   ;;  %v2471_v10 = vmov (!%p493_p9), 0.0   ;;  %vm2472_vm0 = vmmov (!%p493_p9), 0   ;;  %vm795_vm1 = vcmask (!%p493_p9), 1043456  }
  0x17   : > { %496 = sbr.rel (%p493_p9) target bundleno = 4697 (0x1259), region = 84  ;;  %2352 = vset.pattern.permute.xlu0 (!%p493_p9), %v2470_v2  ;;  %s3010_s3 = sld [smem:[#allocation12_spill]] (!%p493_p9)  ;;  %vm791_vm2 = vcmask (!%p493_p9), 64512   ;;  %v556_v33 = vlaneseq (!%p493_p9) }
  0x18   : > { %s3011_s0 = sld [smem:[#allocation9_spill]] (!%p493_p9)  ;;  %s3013_s4 = sld [smem:[#allocation13_spill]] (!%p493_p9) }
  0x19   : > { %v772_v36 = vshrl.u32 (!%p493_p9), %v556_v33, 7  ;;  %s538_s21 = sand.u32 (!%p493_p9), 1, %s2460_s25   ;;  %s2101_s19 = sshll.u32 (!%p493_p9), %s2585_s28, 7 }
  0x1a   : > { %s2473_s23 = smov (!%p493_p9), [#allocation2]  }
  0x1b   : > { %v773_v38 = vsub.s32 (!%p493_p9), 0, %v772_v36  ;;  %s2410_s29 = sshll.u32 (!%p493_p9), %s2473_s23, 4  ;;  %s2411_s29 = int_to_ptr.vmem [resolvable:$false] %s2410_s29 }
  0x1c   : > { %v2354_v0 = vld [vmem:[%s3009_s2] sm:$0xff] (!%p493_p9)   ;;  %v2355_v1 = vld [vmem:[%s3009_s2 + $0x10] sm:$0xff] (!%p493_p9)   ;;  %v2356_v8 = vld [vmem:[%s3009_s2 + $0x8] sm:$0xff] (!%p493_p9)  }
  0x1d   : > { %2164 = vmatprep.mubr.bf16.mxu0 (!%p493_p9), %v2354_v0  ;;  %2168 = vmatprep.mubr.bf16.mxu1 (!%p493_p9), %v2355_v1  ;;  %v579_v3 = vld [vmem:[%s3010_s3] sm:$0xff] (!%p493_p9)  ;;  %v580_v7 = vld [vmem:[%s3010_s3 + $0x8] sm:$0xff] (!%p493_p9)  ;;  %v2357_v9 = vld [vmem:[%s3009_s2 + $0x18] sm:$0xff] (!%p493_p9)  }
  0x1e   : > { %s2620_s30 = scalar_select %p547_p10, %s2585_s28, 1  ;;  %593 = vperm.xlu0 %2352, %v579_v3   ;;  %v583_v5 = vld [vmem:[%s3010_s3 + $0x20] sm:$0xff]  ;;  %v2359_v12 = vld [vmem:[%s3009_s2 + $0x28] sm:$0xff]   ;;  %v585_v51 = vld [vmem:[%s3010_s3 + $0x30] sm:$0xff] }
  0x1f   : > { %v2358_v11 = vld [vmem:[%s3009_s2 + $0x20] sm:$0xff]   ;;  %v584_v47 = vld [vmem:[%s3010_s3 + $0x28] sm:$0xff] }
  0x20   : > { %s2997_s18 = sshll.u32 %s2620_s30, 3  ;;  %v587_v46 = vld [vmem:[%s3010_s3 + $0x40] sm:$0xff] }
  0x21   : > { %s550_s20 = scalar_lea.vmem %s3011_s0, %s2997_s18  ;;  %s2931_s0 = scalar_lea.hbm %s2991_s16, %s2101_s19 }
  0x22   : > { %v2631_v4 = vld [vmem:[%s550_s20] sm:$0xff]  ;;  %613 = vperm.xlu0 %2352, %v583_v5   ;;  %s3012_s20 = sld [smem:[#allocation10_spill]] }
  0x23   : > { %v566_v6 = vpack.c.bf16 %v2631_v4, %v2631_v4 }
  0x25   : > { %2162 = vmatprep.subr.bf16.mxu0 %v566_v6  ;;  %2308 = vmatprep.subr.bf16.mxu1 %v566_v6 }
  0x26   : > { %2163 = vmatpush3.bf16.xpose.msra.mxu0 %v566_v6  ;;  %2309 = vmatpush3.bf16.xpose.msra.mxu1 %v566_v6 }
  0x27   : > { %598 = vperm.xlu0 %2352, %v580_v7   ;;  %2176 = vmatprep.subr.bf16.mxu1 %v2471_v10 }
  0x28   : > { %2200 = vmatprep.subr.bf16.mxu0 %v2471_v10  ;;  %s562_s22 = scalar_lea.vmem %s3012_s20, %s2585_s28  ;;  %s1938_s20 = scalar_lea.sflag [#allocation3], %s538_s21 }
  0x29   : > { %v563_v34 = vld [vmem:[%s562_s22] sm:$0x1]  ;;  %s2046_s22 = sshll.u32 %s538_s21, 3 }
  0x2a   : > { %v564_v35 = vsub.f32 1.0, %v563_v34  ;;  %s540_s26 = scalar_lea.vmem [#allocation2], %s2046_s22  ;;  %s2412_s22 = scalar_lea.vmem %s2411_s29, 256 }
  0x2b   : > { %s1955_s18 = sshll.u32 %s540_s26, 4  ;;  %s1956_s18 = int_to_ptr.vmem [resolvable:$true] %s1955_s18 }
  0x2c   : > { %v565_v37 = vmul.f32 -1e+09, %v564_v35  ;;  %p2413_p0 = scmp.lt.s32.totalorder %s1956_s18, %s2411_s29 }
  0x2d   : > { %2165 = vmatmul.mubr.bf16.vlgmr.msra.gmra.mrb[0].mxu0 %v2356_v8  ;;  %2169 = vmatmul.mubr.bf16.vlgmr.msra.gmra.mrb[0].mxu1 %v2357_v9 }
  0x2e   : > { %2202 = vmatprep.mubr.msk.bf16.mxu0 %vm2472_vm0, %v2471_v10  ;;  %2172 = vmatprep.mubr.bf16.mxu1 %v2358_v11  ;;  %v2683_v39 = vrot.slane %v565_v37, %v773_v38 }
  0x35   : > { %2173 = vmatmul.mubr.bf16.gmra.mrb[4].mxu1 %v2359_v12 }
  0x36   : > { %2178 = vmatprep.mubr.msk.bf16.mxu1 %vm2472_vm0, %v2471_v10 }
  0x9d   : > { %v594_v13 = vpop.permute.xlu0 %593 }
  0xa1   : > { %v614_v14 = vpop.permute.xlu0 %613 }
  0xa6   : > { %v599_v48 = vpop.permute.xlu0 %598 }
 0x100   : > { %v2659_v15 = vpop.f32.mrb[0].mxu0  ;;  %v2661_v16 = vpop.f32.mrb[0].mxu1 }
 0x101   : > { %v721_v17 = vpop.f32.mrb[1].mxu0  ;;  %v737_v18 = vpop.f32.mrb[1].mxu1 }
 0x102   : > { %v738_v19 = vadd.f32 %v737_v18, %v614_v14  ;;  %v2663_v20 = vpop.f32.mrb[2].mxu0  ;;  %v722_v21 = vadd.f32 %v721_v17, %v594_v13  ;;  %v2665_v22 = vpop.f32.mrb[2].mxu1 }
 0x103   : > { %v724_v23 = vpop.f32.mrb[3].mxu0  ;;  %v740_v24 = vpop.f32.mrb[3].mxu1 }
 0x104   : > { %v769_v25 = vpack.c.bf16 %v738_v19, %v738_v19  ;;  %v768_v26 = vpack.c.bf16 %v722_v21, %v722_v21  ;;  %v725_v49 = vadd.f32 %v724_v23, %v599_v48 }
 0x106   : > { %v797_v27 = vsel %vm795_vm1, %v769_v25, 0  ;;  %775 = vxpose.xlu1.c.b16.start.end [1/1] (short) (narrow) %v768_v26, 16  ;;  %v899_v50 = vpack.c.bf16 %v725_v49, %v725_v49 }
 0x107   : > { %2177 = vmatpush3.bf16.msra.mxu1 %v797_v27  ;;  %v588_v27 = vld [vmem:[%s3010_s3 + $0x48] sm:$0xff] }
 0x108   : > { %2182 = vmatprep.subr.bf16.mxu1 %v2471_v10  ;;  %v2669_v28 = vpop.f32.mrb[4].mxu1 }
 0x109   : > { %v753_v29 = vpop.f32.mrb[5].mxu1 }
 0x10a   : > { %2353 = vset.pattern.permute.xlu1 %v2470_v2  ;;  %v2671_v30 = vpop.f32.mrb[6].mxu1 }
 0x10b   : > { %v2673_v31 = vpop.f32.mrb[7].mxu1 }
 0x16c   : > { %v783_v32 = vpop.trf.xlu1 }
 0x16d   : > { %2179 = vmatmul.mubr.msk.bf16.vlgmr.msra.gmra.mrb[8].mxu1 %vm791_vm2, %v783_v32 }
 0x16e   : > { %2184 = vmatprep.mubr.msk.bf16.mxu1 %vm2472_vm0, %v2471_v10 }
 0x240   : > { %v833_v40 = vpop.f32.mrb[8].mxu1 }
 0x241   : > { %v834_v41 = vadd.f32 %v833_v40, %v2683_v39  ;;  %v2180_v42 = vpop.f32.mrb[9].mxu1 }
 0x242   : > { %v836_v43 = vpop.f32.mrb[10].mxu1 }
 0x243   : > { %v2181_v44 = vpop.f32.mrb[11].mxu1  ;;  %v839_v45 = vsel %vm791_vm2, %v834_v41, -inf }
 0x244   : > { %840 = vmax.xlane.f32.xlu1 %v839_v45  ;;  %v582_v44 = vld [vmem:[%s3010_s3 + $0x18] sm:$0xff] }
 0x255   : > { %633 = vperm.xlu1 %2353, %v587_v46  }
 0x259   : > { %618 = vperm.xlu1 %2353, %v584_v47  }
 0x27c   : > { %902 = vxpose.xlu1.c.b16.start.end [1/1] (short) (narrow) %v899_v50, 16 }
 0x280   : > { %623 = vperm.xlu1 %2353, %v585_v51  }
 0x2d1   : > { %v841_v52 = vpop.xlane.xlu1 %840 }
 0x2d2   : > { %v842_v53 = vsub.f32 %v834_v41, %v841_v52 }
 0x2d4   : > { %v843_v54 = vmul.f32 1.442695, %v842_v53 }
 0x2d5   : > { %v634_v58 = vpop.permute.xlu1 %633 }
 0x2d6   : > { %2384 = vpow2.f32 %v843_v54  ;;  %v754_v1 = vadd.f32 %v753_v29, %v634_v58  ;;  %v581_v29 = vld [vmem:[%s3010_s3 + $0x10] sm:$0xff] }
 0x2d8   : > { %v770_v3 = vpack.c.bf16 %v754_v1, %v754_v1 }
 0x2d9   : > { %v619_v61 = vpop.permute.xlu1 %618 }
 0x2da   : > { %v741_v63 = vadd.f32 %v740_v24, %v619_v61 }
 0x2dc   : > { %v900_v2 = vpack.c.bf16 %v741_v63, %v741_v63 }
 0x2de   : > { %v922_v5 = vsel %vm795_vm1, %v900_v2, 0  ;;  %v589_v2 = vld [vmem:[%s3010_s3 + $0x50] sm:$0xff] }
 0x2e0   : > { %v2385_v55 = vpop.eup %2384 }
 0x2e1   : > { %v845_v56 = vsel %vm791_vm2, %v2385_v55, 0.0 }
 0x2e2   : > { %846 = vadd.xlane.f32.xlu0 %v845_v56  ;;  %v910_v6 = vpop.trf.xlu1 }
 0x2ff   : > { %v624_v51 = vpop.permute.xlu1 %623 }
 0x300   : > { %v746_v52 = vadd.f32 %v2661_v16, %v624_v51 }
 0x302   : > { %v1149_v53 = vpack.c.bf16 %v746_v52, %v746_v52 }
 0x36f   : > { %v847_v57 = vpop.xlane.xlu0 %846 }
 0x370   : > { %2386 = vrcp.f32 %v847_v57 }
 0x37a   : > { %v2387_v59 = vpop.eup %2386 }
 0x37b   : > { %v849_v60 = vmul.f32 %v2387_v59, %v2385_v55  ;;  %v1171_v55 = vsel %vm795_vm1, %v1149_v53, 0 }
 0x37d   : > { %v850_v62 = vpack.c.bf16 %v849_v60, %v849_v60 }
 0x37f   : > { %v855_v0 = vsel %vm791_vm2, %v850_v62, 0 }
 0x380   : > { %2183 = vmatpush3.bf16.xpose.msra.mxu1 %v855_v0 }
 0x381   : > { %2188 = vmatprep.subr.bf16.mxu1 %v2471_v10 }
 0x387   : > { %2185 = vmatmul.mubr.msk.bf16.vlgmr.msra.gmra.mrb[12].mxu1 %vm791_vm2, %v770_v3  ;;  %v586_v3 = vld [vmem:[%s3010_s3 + $0x38] sm:$0xff] }
 0x388   : > { %2189 = vmatpush3.bf16.msra.mxu1 %v922_v5  ;;  %2190 = vmatprep.mubr.msk.bf16.mxu1 %vm2472_vm0, %v2471_v10  ;;  %v898_v5 = vld [vmem:[%s3013_s4] sm:$0xf] }
 0x389   : > { %2194 = vmatprep.subr.bf16.mxu1 %v2471_v10 }
 0x38f   : > { %2191 = vmatmul.mubr.msk.bf16.vlgmr.msra.gmra.mrb[16].mxu1 %vm791_vm2, %v910_v6  ;;  %v1106_v6 = vsel %vm795_vm1, %v898_v5, 0 }
 0x390   : > { %2196 = vmatprep.mubr.msk.bf16.mxu1 %vm2472_vm0, %v2471_v10 }
 0x45a   : > { %v2707_v7 = vpop.f32.mrb[12].mxu1 }
 0x45b   : > { %v2186_v8 = vpop.f32.mrb[13].mxu1 }
 0x45c   : > { %v894_v9 = vpop.f32.mrb[14].mxu1  ;;  %v897_v8 = vpack.c.bf16 %v2707_v7, %v2707_v7 }
 0x45d   : > { %v2187_v11 = vpop.f32.mrb[15].mxu1 }
 0x462   : > { %v958_v12 = vpop.f32.mrb[16].mxu1 }
 0x463   : > { %v959_v13 = vadd.f32 %v958_v12, %v2683_v39  ;;  %v2192_v14 = vpop.f32.mrb[17].mxu1 }
 0x464   : > { %v961_v17 = vpop.f32.mrb[18].mxu1 }
 0x465   : > { %v2193_v18 = vpop.f32.mrb[19].mxu1  ;;  %v964_v19 = vsel %vm791_vm2, %v959_v13, -inf }
 0x466   : > { %965 = vmax.xlane.f32.xlu0 %v964_v19 }
 0x4f3   : > { %v966_v21 = vpop.xlane.xlu0 %965 }
 0x4f4   : > { %v967_v23 = vsub.f32 %v959_v13, %v966_v21 }
 0x4f6   : > { %v968_v24 = vmul.f32 1.442695, %v967_v23 }
 0x4f8   : > { %2388 = vpow2.f32 %v968_v24 }
 0x502   : > { %v2389_v25 = vpop.eup %2388 }
 0x503   : > { %v970_v26 = vsel %vm791_vm2, %v2389_v25, 0.0 }
 0x504   : > { %971 = vadd.xlane.f32.xlu0 %v970_v26 }
 0x51a   : > { %638 = vperm.xlu0 %2352, %v588_v27  }
 0x51e   : > { %603 = vperm.xlu0 %2352, %v581_v29  }
 0x591   : > { %v972_v32 = vpop.xlane.xlu0 %971 }
 0x592   : > { %2390 = vrcp.f32 %v972_v32 }
 0x599   : > { %v639_v34 = vpop.permute.xlu0 %638 }
 0x59a   : > { %v757_v43 = vadd.f32 %v2673_v31, %v639_v34 }
 0x59c   : > { %v2391_v35 = vpop.eup %2390  ;;  %v901_v45 = vpack.c.bf16 %v757_v43, %v757_v43 }
 0x59d   : > { %v604_v36 = vpop.permute.xlu0 %603  ;;  %v974_v37 = vmul.f32 %v2391_v35, %v2389_v25 }
 0x59e   : > { %v730_v38 = vadd.f32 %v2659_v15, %v604_v36  ;;  %v1023_v15 = vld [vmem:[%s3013_s4 + $0x4] sm:$0xf] }
 0x59f   : > { %v975_v40 = vpack.c.bf16 %v974_v37, %v974_v37  ;;  %v1044_v46 = vsel %vm795_vm1, %v1023_v15, 0 }
 0x5a0   : > { %v1148_v41 = vpack.c.bf16 %v730_v38, %v730_v38  ;;  %2201 = vmatpush3.bf16.msra.mxu0 %v1044_v46 }
 0x5a1   : > { %v980_v42 = vsel %vm791_vm2, %v975_v40, 0  ;;  %2212 = vmatprep.subr.bf16.mxu0 %v2471_v10 }
 0x5a2   : > { %2195 = vmatpush3.bf16.xpose.msra.mxu1 %v980_v42  ;;  %1151 = vxpose.xlu1.c.b16.start.end [1/1] (short) (narrow) %v1148_v41, 16  ;;  %v1272_v42 = vld [vmem:[%s3013_s4 + $0x8] sm:$0xf] }
 0x5a3   : > { %2206 = vmatprep.subr.bf16.mxu1 %v2471_v10  ;;  %v1293_v43 = vsel %vm795_vm1, %v1272_v42, 0  ;;  %v2367_v42 = vld [vmem:[%s2983_s8 + $0x38] sm:$0xff]  }
 0x5a6   : > { %608 = vperm.xlu1 %2353, %v582_v44  }
 0x5a9   : > { %2197 = vmatmul.mubr.msk.bf16.vlgmr.msra.gmra.mrb[20].mxu1 %vm791_vm2, %v901_v45 }
 0x5aa   : > { %2208 = vmatprep.mubr.msk.bf16.mxu1 %vm2472_vm0, %v2471_v10  ;;  %2207 = vmatpush3.bf16.msra.mxu1 %v1106_v6 }
 0x5ab   : > { %2218 = vmatprep.subr.bf16.mxu1 %v2471_v10 }
 0x608   : > { %v1159_v56 = vpop.trf.xlu1 }
 0x625   : > { %v609_v7 = vpop.permute.xlu1 %608 }
 0x626   : > { %v733_v24 = vadd.f32 %v2663_v20, %v609_v7 }
 0x628   : > { %v1336_v25 = vpack.c.bf16 %v733_v24, %v733_v24 }
 0x67c   : > { %v1016_v31 = vpop.f32.mrb[20].mxu1 }
 0x67d   : > { %v1022_v47 = vpack.c.bf16 %v1016_v31, %v1016_v31  ;;  %v2198_v48 = vpop.f32.mrb[21].mxu1 }
 0x67e   : > { %v1019_v49 = vpop.f32.mrb[22].mxu1 }
 0x67f   : > { %1024 = vxpose.xlu0.c.b16.start.end [1/1] (short) (narrow) %v1022_v47, 16  ;;  %v2199_v50 = vpop.f32.mrb[23].mxu1 }
 0x6e5   : > { %v1032_v54 = vpop.trf.xlu0 }
 0x6e6   : > { %2203 = vmatmul.mubr.msk.bf16.vlgmr.msra.gmra.mrb[4].mxu0 %vm791_vm2, %v1032_v54 }
 0x6e7   : > { %2213 = vmatpush3.bf16.msra.mxu0 %v1171_v55  ;;  %2214 = vmatprep.mubr.msk.bf16.mxu0 %vm2472_vm0, %v2471_v10 }
 0x6e8   : > { %2224 = vmatprep.subr.bf16.mxu0 %v2471_v10 }
 0x6ee   : > { %2215 = vmatmul.mubr.msk.bf16.vlgmr.msra.gmra.mrb[8].mxu0 %vm791_vm2, %v1159_v56 }
 0x6ef   : > { %2226 = vmatprep.mubr.msk.bf16.mxu0 %vm2472_vm0, %v2471_v10  ;;  %2225 = vmatpush3.bf16.msra.mxu0 %v1293_v43 }
 0x6f0   : > { %2236 = vmatprep.subr.bf16.mxu0 %v2471_v10 }
 0x7b9   : > { %v1080_v57 = vpop.f32.mrb[4].mxu0 }
 0x7ba   : > { %v2204_v16 = vpop.f32.mrb[5].mxu0 }
 0x7bb   : > { %v1083_v58 = vpop.f32.mrb[6].mxu0 }
 0x7bc   : > { %v2205_v59 = vpop.f32.mrb[7].mxu0 }
 0x7c1   : > { %v1207_v60 = vpop.f32.mrb[8].mxu0 }
 0x7c2   : > { %v1208_v61 = vadd.f32 %v1207_v60, %v2683_v39  ;;  %v2216_v62 = vpop.f32.mrb[9].mxu0 }
 0x7c3   : > { %v1210_v63 = vpop.f32.mrb[10].mxu0 }
 0x7c4   : > { %v2217_v0 = vpop.f32.mrb[11].mxu0  ;;  %v1213_v1 = vsel %vm791_vm2, %v1208_v61, -inf }
 0x7c5   : > { %1214 = vmax.xlane.f32.xlu0 %v1213_v1 }
 0x7db   : > { %643 = vperm.xlu0 %2352, %v589_v2  }
 0x7df   : > { %628 = vperm.xlu0 %2352, %v586_v3  }
 0x7fd   : > { %1086 = vxpose.xlu0.c.b16.start.end [1/1] (short) (narrow) %v897_v8, 16 }
 0x852   : > { %v1215_v9 = vpop.xlane.xlu0 %1214 }
 0x853   : > { %v1216_v11 = vsub.f32 %v1208_v61, %v1215_v9  ;;  %v1460_v9 = vld [vmem:[%s3013_s4 + $0xc] sm:$0xf]  ;;  %s2406_s4 = scalar_lea.vmem %s1956_s18, 128 }
 0x854   : > { %p2407_p11 = scmp.ne.s32.totalorder %s1956_s18, %s2406_s4  ;;  %p2414_p1 = scmp.lt.s32.totalorder %s2412_s22, %s2406_s4 }
 0x855   : > { %v1217_v12 = vmul.f32 1.442695, %v1216_v11  ;;  %v1481_v11 = vsel %vm795_vm1, %v1460_v9, 0 }
 0x856   : > { %p2408_p12 = pnand %p2407_p11, %p2602_p5  ;;  %p2415_p2 = por %p2414_p1, %p2413_p0 }
 0x857   : > { %2392 = vpow2.f32 %v1217_v12 }
 0x858   : > { %p2409_p13 = pneg %p2408_p12 }
 0x85a   : > { %v644_v13 = vpop.permute.xlu0 %643  ;;  %p2416_p3 = pnand %p2415_p2, %p2409_p13 }
 0x85b   : > { %v762_v14 = vadd.f32 %v2669_v28, %v644_v13 }
 0x85d   : > { %v1150_v34 = vpack.c.bf16 %v762_v14, %v762_v14 }
 0x85e   : > { %v629_v17 = vpop.permute.xlu0 %628 }
 0x85f   : > { %v749_v18 = vadd.f32 %v2665_v22, %v629_v17 }
 0x861   : > { %v2393_v19 = vpop.eup %2392  ;;  %v1337_v32 = vpack.c.bf16 %v749_v18, %v749_v18 }
 0x862   : > { %v1219_v21 = vsel %vm791_vm2, %v2393_v19, 0.0 }
 0x863   : > { %1220 = vadd.xlane.f32.xlu1 %v1219_v21  ;;  %v1094_v23 = vpop.trf.xlu0  ;;  %v1359_v35 = vsel %vm795_vm1, %v1337_v32, 0  ;;  %v2068_v21 = vld [vmem:[%s2980_s5] ss:$0 sm:$0xff] }
 0x864   : > { %2209 = vmatmul.mubr.msk.bf16.vlgmr.msra.gmra.mrb[24].mxu1 %vm791_vm2, %v1094_v23 }
 0x865   : > { %2220 = vmatprep.mubr.msk.bf16.mxu1 %vm2472_vm0, %v2471_v10 }
 0x890   : > { %1339 = vxpose.xlu1.c.b16.start.end [1/1] (short) (narrow) %v1336_v25, 16 }
 0x8f0   : > { %v1221_v26 = vpop.xlane.xlu1 %1220 }
 0x8f1   : > { %2394 = vrcp.f32 %v1221_v26 }
 0x8f6   : > { %v1347_v20 = vpop.trf.xlu1 }
 0x8fb   : > { %v2395_v28 = vpop.eup %2394 }
 0x8fc   : > { %v1223_v27 = vmul.f32 %v2395_v28, %v2393_v19 }
 0x8fe   : > { %v1224_v22 = vpack.c.bf16 %v1223_v27, %v1223_v27  ;;  %v2360_v27 = vld [vmem:[%s2983_s8] sm:$0xff]  }
 0x900   : > { %v1229_v29 = vsel %vm791_vm2, %v1224_v22, 0  ;;  %v2361_v22 = vld [vmem:[%s2983_s8 + $0x8] sm:$0xff]  }
 0x901   : > { %2219 = vmatpush3.bf16.xpose.msra.mxu1 %v1229_v29  ;;  %v557_v29 = vand.u32 127, %v556_v33  ;;  %v2363_v33 = vld [vmem:[%s2983_s8 + $0x18] sm:$0xff]  }
 0x902   : > { %2230 = vmatprep.subr.bf16.mxu1 %v2471_v10 }
 0x903   : > { %vm558_vm3 = vcmp.lt.s32.totalorder %v557_v29, 32  ;;  %v2380_v29 = vld [vmem:[%s2989_s14 + $0x20] sm:$0xff]  }
 0x908   : > { %2221 = vmatmul.mubr.msk.bf16.vlgmr.msra.gmra.mrb[28].mxu1 %vm791_vm2, %v1150_v34  ;;  %v2816_v34 = vsel %vm558_vm3, 1.0, %v2471_v10 }
 0x909   : > { %2231 = vmatpush3.bf16.msra.mxu1 %v1359_v35  ;;  %2232 = vmatprep.mubr.msk.bf16.mxu1 %vm2472_vm0, %v2471_v10 }
 0x90a   : > { %2242 = vmatprep.subr.bf16.mxu1 %v2471_v10 }
 0x910   : > { %2233 = vmatmul.mubr.msk.bf16.vlgmr.msra.gmra.mrb[32].mxu1 %vm791_vm2, %v1347_v20 }
 0x911   : > { %2244 = vmatprep.mubr.msk.bf16.mxu1 %vm2472_vm0, %v2471_v10  ;;  %2243 = vmatpush3.bf16.msra.mxu1 %v1481_v11 }
 0x912   : > { %2268 = vmatprep.subr.bf16.mxu1 %v2471_v10 }
 0x937   : > { %v1142_v36 = vpop.f32.mrb[24].mxu1 }
 0x938   : > { %v1143_v37 = vadd.f32 %v1142_v36, %v1080_v57  ;;  %v2210_v38 = vpop.f32.mrb[25].mxu1 }
 0x939   : > { %v1145_v40 = vpop.f32.mrb[26].mxu1  ;;  %v2364_v38 = vld [vmem:[%s2983_s8 + $0x20] sm:$0xff]  }
 0x93a   : > { %v2211_v41 = vpop.f32.mrb[27].mxu1  ;;  %v2365_v40 = vld [vmem:[%s2983_s8 + $0x28] sm:$0xff]  }
 0x93b   : > { %v2366_v41 = vld [vmem:[%s2983_s8 + $0x30] sm:$0xff]  }
 0x9db   : > { %v1265_v44 = vpop.f32.mrb[28].mxu1 }
 0x9dc   : > { %v1271_v45 = vpack.c.bf16 %v1265_v44, %v1265_v44  ;;  %v2222_v15 = vpop.f32.mrb[29].mxu1 }
 0x9dd   : > { %v1268_v46 = vpop.f32.mrb[30].mxu1 }
 0x9de   : > { %1273 = vxpose.xlu1.c.b16.start.end [1/1] (short) (narrow) %v1271_v45, 16  ;;  %v2223_v31 = vpop.f32.mrb[31].mxu1  ;;  %v2069_v46 = vld [vmem:[%s2981_s6] ss:$0 sm:$0xff] }
 0x9e3   : > { %v1395_v47 = vpop.f32.mrb[32].mxu1 }
 0x9e4   : > { %v1396_v48 = vadd.f32 %v1395_v47, %v2683_v39  ;;  %v2234_v49 = vpop.f32.mrb[33].mxu1  ;;  %v590_v39 = vld [vmem:[%s3010_s3 + $0x58] sm:$0xff]  ;;  %v2070_v47 = vld [vmem:[%s2982_s7] ss:$0 sm:$0xff] }
 0x9e5   : > { %v1398_v50 = vpop.f32.mrb[34].mxu1 }
 0x9e6   : > { %v2235_v51 = vpop.f32.mrb[35].mxu1  ;;  %v1401_v52 = vsel %vm791_vm2, %v1396_v48, -inf }
 0x9e7   : > { %1402 = vmax.xlane.f32.xlu0 %v1401_v52  ;;  %v2368_v51 = vld [vmem:[%s2985_s10] sm:$0xff]   ;;  %v2369_v52 = vld [vmem:[%s2985_s10 + $0x8] sm:$0xff]  }
 0xa44   : > { %v1281_v53 = vpop.trf.xlu1 }
 0xa45   : > { %2227 = vmatmul.mubr.msk.bf16.vlgmr.msra.gmra.mrb[12].mxu0 %vm791_vm2, %v1281_v53  ;;  %v2370_v53 = vld [vmem:[%s2985_s10 + $0x10] sm:$0xff]  }
 0xa46   : > { %2238 = vmatprep.mubr.msk.bf16.mxu0 %vm2472_vm0, %v2471_v10 }
 0xa74   : > { %v1403_v54 = vpop.xlane.xlu0 %1402 }
 0xa75   : > { %v1404_v55 = vsub.f32 %v1396_v48, %v1403_v54  ;;  %v2371_v54 = vld [vmem:[%s2985_s10 + $0x18] sm:$0xff]  }
 0xa77   : > { %v1405_v56 = vmul.f32 1.442695, %v1404_v55  ;;  %v2372_v55 = vld [vmem:[%s2985_s10 + $0x20] sm:$0xff]  }
 0xa79   : > { %2396 = vpow2.f32 %v1405_v56  ;;  %v2373_v56 = vld [vmem:[%s2985_s10 + $0x28] sm:$0xff]  }
 0xa83   : > { %v2397_v57 = vpop.eup %2396 }
 0xa84   : > { %v1407_v16 = vsel %vm791_vm2, %v2397_v57, 0.0 }
 0xa85   : > { %1408 = vadd.xlane.f32.xlu0 %v1407_v16  ;;  %v2375_v16 = vld [vmem:[%s2985_s10 + $0x38] sm:$0xff]  }
 0xa9b   : > { %648 = vperm.xlu0 %2352, %v590_v39   ;;  %v2071_v39 = vld [vmem:[%s2984_s9] ss:$0 sm:$0xff] }
 0xb12   : > { %v1409_v58 = vpop.xlane.xlu0 %1408 }
 0xb13   : > { %2398 = vrcp.f32 %v1409_v58 }
 0xb18   : > { %v1329_v59 = vpop.f32.mrb[12].mxu0 }
 0xb19   : > { %v1335_v60 = vadd.f32 %v1329_v59, %v1143_v37  ;;  %v2228_v61 = vpop.f32.mrb[13].mxu0  ;;  %v2362_v37 = vld [vmem:[%s2983_s8 + $0x10] sm:$0xff]  }
 0xb1a   : > { %v1332_v62 = vpop.f32.mrb[14].mxu0  ;;  %v649_v3 = vpop.permute.xlu0 %648 }
 0xb1b   : > { %v2229_v63 = vpop.f32.mrb[15].mxu0  ;;  %v765_v6 = vadd.f32 %v2671_v30, %v649_v3 }
 0xb1d   : > { %v2399_v0 = vpop.eup %2398  ;;  %v1338_v8 = vpack.c.bf16 %v765_v6, %v765_v6 }
 0xb1e   : > { %v1411_v1 = vmul.f32 %v2399_v0, %v2397_v57  ;;  %v2374_v57 = vld [vmem:[%s2985_s10 + $0x30] sm:$0xff]  }
 0xb20   : > { %v1412_v2 = vpack.c.bf16 %v1411_v1, %v1411_v1 }
 0xb22   : > { %v1417_v5 = vsel %vm791_vm2, %v1412_v2, 0 }
 0xb23   : > { %2237 = vmatpush3.bf16.xpose.msra.mxu0 %v1417_v5 }
 0xb24   : > { %2248 = vmatprep.subr.bf16.mxu0 %v2471_v10 }
 0xb2a   : > { %2239 = vmatmul.mubr.msk.bf16.vlgmr.msra.gmra.mrb[16].mxu0 %vm791_vm2, %v1338_v8 }
 0xb2b   : > { %2264 = vmatprep.mubr.msk.bf16.mxu0 %vm2472_vm0, %v2471_v10  ;;  %2249 = vmatpush3.bf16.msra.mxu0 %v2360_v27  ;;  %v2378_v27 = vld [vmem:[%s2989_s14 + $0x10] sm:$0xff]  }
 0xb2c   : > { %2250 = vmatprep.subr.bf16.mxu0 %v2471_v10 }
 0xb2f   : > { %2251 = vmatpush3.bf16.msra.mxu0 %v2361_v22  ;;  %v2379_v22 = vld [vmem:[%s2989_s14 + $0x18] sm:$0xff]  }
 0xb30   : > { %2252 = vmatprep.subr.bf16.mxu0 %v2471_v10 }
 0xb33   : > { %2253 = vmatpush3.bf16.msra.mxu0 %v2362_v37 }
 0xb34   : > { %2254 = vmatprep.subr.bf16.mxu0 %v2471_v10 }
 0xb37   : > { %2255 = vmatpush3.bf16.msra.mxu0 %v2363_v33  ;;  %v2089_v33 = vld [vmem:[%s2987_s12] ss:$0 sm:$0xff] }
 0xb38   : > { %2256 = vmatprep.subr.bf16.mxu0 %v2471_v10 }
 0xb3b   : > { %2257 = vmatpush3.bf16.msra.mxu0 %v2364_v38 }
 0xb3c   : > { %2258 = vmatprep.subr.bf16.mxu0 %v2471_v10 }
 0xb3f   : > { %2259 = vmatpush3.bf16.msra.mxu0 %v2365_v40  ;;  %v2090_v40 = vld [vmem:[%s2988_s13] ss:$0 sm:$0xff] }
 0xb40   : > { %2260 = vmatprep.subr.bf16.mxu0 %v2471_v10 }
 0xb43   : > { %2261 = vmatpush3.bf16.msra.mxu0 %v2366_v41 }
 0xb44   : > { %2262 = vmatprep.subr.bf16.mxu0 %v2471_v10 }
 0xb47   : > { %2263 = vmatpush3.bf16.msra.mxu0 %v2367_v42 }
 0xb48   : > { %2288 = vmatprep.subr.bf16.mxu0 %v2471_v10 }
 0xbfd   : > { %v1453_v12 = vpop.f32.mrb[16].mxu0 }
 0xbfe   : > { %v1459_v13 = vpack.c.bf16 %v1453_v12, %v1453_v12  ;;  %v2240_v30 = vpop.f32.mrb[17].mxu0  ;;  %v2080_v12 = vld [vmem:[%s2986_s11] ss:$0 sm:$0xff] }
 0xbff   : > { %v1456_v14 = vpop.f32.mrb[18].mxu0 }
 0xc00   : > { %1461 = vxpose.xlu1.c.b16.start.end [1/1] (short) (narrow) %v1459_v13, 16  ;;  %v2241_v17 = vpop.f32.mrb[19].mxu0 }
 0xc66   : > { %v1469_v18 = vpop.trf.xlu1 }
 0xc67   : > { %2245 = vmatmul.mubr.msk.bf16.vlgmr.msra.gmra.mrb[36].mxu1 %vm791_vm2, %v1469_v18 }
 0xc68   : > { %2284 = vmatprep.mubr.msk.bf16.mxu1 %vm2472_vm0, %v2471_v10  ;;  %2269 = vmatpush3.bf16.msra.mxu1 %v2368_v51 }
 0xc69   : > { %2270 = vmatprep.subr.bf16.mxu1 %v2471_v10 }
 0xc6c   : > { %2271 = vmatpush3.bf16.msra.mxu1 %v2369_v52 }
 0xc6d   : > { %2272 = vmatprep.subr.bf16.mxu1 %v2471_v10 }
 0xc70   : > { %2273 = vmatpush3.bf16.msra.mxu1 %v2370_v53 }
 0xc71   : > { %2274 = vmatprep.subr.bf16.mxu1 %v2471_v10 }
 0xc74   : > { %2275 = vmatpush3.bf16.msra.mxu1 %v2371_v54 }
 0xc75   : > { %2276 = vmatprep.subr.bf16.mxu1 %v2471_v10 }
 0xc78   : > { %2277 = vmatpush3.bf16.msra.mxu1 %v2372_v55 }
 0xc79   : > { %2278 = vmatprep.subr.bf16.mxu1 %v2471_v10 }
 0xc7c   : > { %2279 = vmatpush3.bf16.msra.mxu1 %v2373_v56 }
 0xc7d   : > { %2280 = vmatprep.subr.bf16.mxu1 %v2471_v10 }
 0xc80   : > { %2281 = vmatpush3.bf16.msra.mxu1 %v2374_v57 }
 0xc81   : > { %2282 = vmatprep.subr.bf16.mxu1 %v2471_v10 }
 0xc84   : > { %2283 = vmatpush3.bf16.msra.mxu1 %v2375_v16 }
 0xd3a   : > { %v1517_v19 = vpop.f32.mrb[36].mxu1 }
 0xd3b   : > { %v1523_v23 = vadd.f32 %v1517_v19, %v1335_v60  ;;  %v2246_v7 = vpop.f32.mrb[37].mxu1 }
 0xd3c   : > { %v1520_v24 = vpop.f32.mrb[38].mxu1 }
 0xd3d   : > { %v1531_v25 = vadd.f32 %v2068_v21, %v1523_v23  ;;  %v2247_v26 = vpop.f32.mrb[39].mxu1  ;;  %v2376_v21 = vld [vmem:[%s2989_s14] sm:$0xff]   ;;  %v2377_v23 = vld [vmem:[%s2989_s14 + $0x8] sm:$0xff]  }
 0xd3f   : > { %v1532_v28 = vadd.f32 %v1531_v25, %v2631_v4 }
 0xd41   : > { %1535 = vadd.xlane.f32.xlu1 %v1532_v28 }
 0xdce   : > { %v1536_v32 = vpop.xlane.xlu1 %1535 }
 0xdcf   : > { %v1537_v4 = vmul.f32 0.03125, %v1536_v32  ;;  %v2381_v32 = vld [vmem:[%s2989_s14 + $0x28] sm:$0xff]  }
 0xdd1   : > { %v1538_v35 = vsub.f32 %v1532_v28, %v1537_v4  ;;  %v2382_v4 = vld [vmem:[%s2989_s14 + $0x30] sm:$0xff]  }
 0xdd3   : > { %v1539_v20 = vmul.f32 %v2816_v34, %v1538_v35 }
 0xdd5   : > { %v1540_v36 = vmul.f32 %v1539_v20, %v1539_v20 }
 0xdd7   : > { %1541 = vadd.xlane.f32.xlu0 %v1540_v36 }
 0xe64   : > { %v1542_v43 = vpop.xlane.xlu0 %1541 }
 0xe65   : > { %v1543_v44 = vmul.f32 0.03125, %v1542_v43 }
 0xe67   : > { %v1544_v45 = vadd.f32 1e-12, %v1543_v44 }
 0xe69   : > { %2400 = vrsqrt.f32 %v1544_v45 }
 0xe73   : > { %v2401_v15 = vpop.eup %2400 }
 0xe74   : > { %v1546_v31 = vmul.f32 %v2401_v15, %v1539_v20 }
 0xe76   : > { %v1553_v48 = vmul.f32 %v2069_v46, %v1546_v31 }
 0xe78   : > { %v1560_v49 = vadd.f32 %v2070_v47, %v1553_v48 }
 0xe7a   : > { %v1561_v50 = vpack.c.bf16 %v1560_v49, %v1560_v49 }
 0xe7c   : > { %2265 = vmatmul.mubr.bf16.vlgmr.msra.gmra.mrb[20].mxu0 %v1561_v50 }
 0xe7d   : > { %2304 = vmatprep.mubr.msk.bf16.mxu0 %vm2472_vm0, %v2471_v10  ;;  %2289 = vmatpush3.bf16.msra.mxu0 %v2376_v21 }
 0xe7e   : > { %2290 = vmatprep.subr.bf16.mxu0 %v2471_v10 }
 0xe81   : > { %2291 = vmatpush3.bf16.msra.mxu0 %v2377_v23 }
 0xe82   : > { %2292 = vmatprep.subr.bf16.mxu0 %v2471_v10 }
 0xe85   : > { %2293 = vmatpush3.bf16.msra.mxu0 %v2378_v27 }
 0xe86   : > { %2294 = vmatprep.subr.bf16.mxu0 %v2471_v10 }
 0xe89   : > { %2295 = vmatpush3.bf16.msra.mxu0 %v2379_v22 }
 0xe8a   : > { %2296 = vmatprep.subr.bf16.mxu0 %v2471_v10 }
 0xe8d   : > { %2297 = vmatpush3.bf16.msra.mxu0 %v2380_v29 }
 0xe8e   : > { %2298 = vmatprep.subr.bf16.mxu0 %v2471_v10 }
 0xe91   : > { %2299 = vmatpush3.bf16.msra.mxu0 %v2381_v32 }
 0xe92   : > { %2300 = vmatprep.subr.bf16.mxu0 %v2471_v10 }
 0xe95   : > { %2301 = vmatpush3.bf16.msra.mxu0 %v2382_v4 }
 0xe96   : > { %2302 = vmatprep.subr.bf16.mxu0 %v2471_v10 }
 0xf4f   : > { %v1667_v58 = vpop.f32.mrb[20].mxu0 }
 0xf50   : > { %v1668_v59 = vadd.f32 %v2071_v39, %v1667_v58  ;;  %v2266_v60 = vpop.f32.mrb[21].mxu0 }
 0xf51   : > { %v1670_v61 = vpop.f32.mrb[22].mxu0 }
 0xf52   : > { %v1673_v62 = vmul.f32 %v1668_v59, %v1668_v59  ;;  %v2267_v63 = vpop.f32.mrb[23].mxu0 }
 0xf54   : > { %v1674_v0 = vmul.f32 %v1673_v62, %v1668_v59 }
 0xf56   : > { %v1675_v1 = vmul.f32 0.044715, %v1674_v0 }
 0xf58   : > { %v1676_v2 = vadd.f32 %v1675_v1, %v1668_v59 }
 0xf5a   : > { %v1677_v3 = vmul.f32 0.7978846, %v1676_v2 }
 0xf5c   : > { %2402 = vtanh.f32 %v1677_v3 }
 0xf66   : > { %v2403_v5 = vpop.eup %2402 }
 0xf67   : > { %v1679_v6 = vadd.f32 1.0, %v2403_v5 }
 0xf69   : > { %v1680_v8 = vmul.f32 0.5, %v1679_v6 }
 0xf6b   : > { %v1681_v9 = vmul.f32 %v1680_v8, %v1668_v59 }
 0xf6d   : > { %v1682_v11 = vpack.c.bf16 %v1681_v9, %v1681_v9 }
 0xf6f   : > { %2285 = vmatmul.mubr.bf16.vlgmr.msra.gmra.mrb[40].mxu1 %v1682_v11 }
0x1042   : > { %v1788_v13 = vpop.f32.mrb[40].mxu1 }
0x1043   : > { %v1789_v30 = vadd.f32 %v2080_v12, %v1788_v13  ;;  %v2286_v14 = vpop.f32.mrb[41].mxu1 }
0x1044   : > { %v1791_v17 = vpop.f32.mrb[42].mxu1 }
0x1045   : > { %v2287_v18 = vpop.f32.mrb[43].mxu1  ;;  %v1794_v19 = vadd.f32 %v1789_v30, %v1560_v49 }
0x1047   : > { %1797 = vadd.xlane.f32.xlu1 %v1794_v19 }
0x10d4   : > { %v1798_v7 = vpop.xlane.xlu1 %1797 }
0x10d5   : > { %v1799_v24 = vmul.f32 0.03125, %v1798_v7 }
0x10d7   : > { %v1800_v25 = vsub.f32 %v1794_v19, %v1799_v24 }
0x10d9   : > { %v1801_v26 = vmul.f32 %v2816_v34, %v1800_v25  ;;  %v2383_v34 = vld [vmem:[%s2989_s14 + $0x38] sm:$0xff]  }
0x10da   : > { %2303 = vmatpush3.bf16.msra.mxu0 %v2383_v34 }
0x10db   : > { %v1802_v28 = vmul.f32 %v1801_v26, %v1801_v26 }
0x10dd   : > { %1803 = vadd.xlane.f32.xlu1 %v1802_v28 }
0x116a   : > { %v1804_v35 = vpop.xlane.xlu1 %1803 }
0x116b   : > { %v1805_v20 = vmul.f32 0.03125, %v1804_v35 }
0x116d   : > { %v1806_v36 = vadd.f32 1e-12, %v1805_v20 }
0x116f   : > { %2404 = vrsqrt.f32 %v1806_v36 }
0x1179   : > { %v2405_v37 = vpop.eup %2404 }
0x117a   : > { %v1808_v38 = vmul.f32 %v2405_v37, %v1801_v26 }
0x117c   : > { %v1815_v10 = vmul.f32 %v2089_v33, %v1808_v38 }
0x117e   : > { %v1822_v41 = vadd.f32 %v2090_v40, %v1815_v10 }
0x1180   : > { %v1824_v42 = vpack.c.bf16 %v1822_v41, %v1822_v41  ;;  %1823 = vst [vmem:[%s540_s26] sm:$0xff] %v1822_v41 }
0x1182   : > { %2305 = vmatmul.mubr.bf16.vlgmr.msra.gmra.mrb[24].mxu0 %v1824_v42 }
0x1183   : > { %2419 = shalt.err (!%p2416_p3)
}
0x1184   : > { %s2420_s2 = scalar_lea.hbm %s2931_s0, 128  ;;  %s2424_s21 = scalar_lea.hbm %s2991_s16, 256 }
0x1185   : > { %p2421_p4 = scmp.ne.s32.totalorder %s2931_s0, %s2420_s2  ;;  %p2425_p9 = scmp.lt.u32.totalorder %s2931_s0, %s2991_s16 }
0x1186   : > { %p2426_p10 = scmp.lt.u32.totalorder %s2424_s21, %s2420_s2  ;;  %p2428_p12 = scmp.lt.u32.totalorder %s2420_s2, %s2931_s0 }
0x1187   : > { %p2422_p7 = pnand %p2421_p4, %p2602_p5 }
0x1188   : > { %p2427_p11 = por %p2426_p10, %p2425_p9 }
0x1189   : > { %p2423_p8 = pneg %p2422_p7 }
0x118a   : > { %p2429_p13 = por %p2428_p12, %p2427_p11 }
0x118c   : > { %p2430_p0 = pnand %p2429_p13, %p2423_p8 }
0x118e   : > { %2433 = shalt.err (!%p2430_p0)
}
0x118f   : > { %2310 = dma.vmem_to_hbm [thread:$0]  (%p2602_p5), %s1956_s18, 128, %s2931_s0, %s1938_s20   ;;  %v2091_v43 = vld [vmem:[%s2990_s15] ss:$0 sm:$0xff] }
0x1190   : > { %s3014_s29 = sshll.u32 %s2620_s30, 3 }
0x1191   : > { %s554_s28 = scalar_lea.vmem %s2992_s17, %s3014_s29 }
0x1255   : > { %v1930_v44 = vpop.f32.mrb[24].mxu0 }
0x1256   : > { %v1931_v45 = vadd.f32 %v2091_v43, %v1930_v44  ;;  %v2306_v15 = vpop.f32.mrb[25].mxu0 }
0x1257   : > { %v1933_v46 = vpop.f32.mrb[26].mxu0 }
0x1258   : > { %1936 = vst [vmem:[%s554_s28] sm:$0xff] %v1931_v45  ;;  %v2307_v31 = vpop.f32.mrb[27].mxu0 }
0x1259 PF: > { %p2316_p5 = scmp.ge.s32.totalorder %s2468_s27, 2  ;;  %s1970_s18 = sand.u32 1, %s2456_s24  }
0x125a   : > { %s1971_s0 = scalar_lea.sflag [#allocation3], %s1970_s18 }
0x125b   : > { %p2313_p1 = pnand %p2316_p5, %p2606_p6 }
0x125d   : > { %2451 = dma.done.wait (!%p2313_p1), %s1971_s0, 128  }
0x125e   : > { %2453 = vsyncadd (!%p2313_p1), %s1971_s0, 4294967168  ;;  %s3016_s27 = sld [smem:[#allocation6_spill]]  ;;  %s3017_s30 = sld [smem:[#allocation5_spill]] }
0x125f   : > { %s3018_s26 = sld [smem:[#allocation7_spill]]  ;;  %s3019_s24 = smov %s2460_s25 }
0x1264   : > { %p28_p2 = scmp.ge.s32.totalorder %s3016_s27, 4   ;;  %s3020_s25 = smov %s3017_s30 }
0x1266   :  { %30 = sbr.rel (!%p28_p2) target bundleno = 9 (0x9), region = 132 }
0x126d   :  { %1983 = vsyncpa [#allocation3], 1 }
0x126e   :  { %1985 = vsyncpa [#allocation3 + $0x1], 1 }

// kernel: distilbert_classifier.2
= control target key start
LH: loop header
LB: loop body
LE: loop exit
PB: predicated region body
PF: predicated region fallthrough
CT: control target
= control target key end

     0   :  { %s2251_s21 = smov 0   ;;  %s2558_s0 = inlined_call_operand.vmem [shape: f32[16,128], index: 0, kind: input, shape index: {}]   ;;  %s2559_s1 = inlined_call_operand.vmem [shape: f32[2,8], index: 1, kind: input, shape index: {}]   ;;  %s2560_s2 = inlined_call_operand.vmem [shape: f32[1,128], index: 2, kind: input, shape index: {}]   ;;  %s2561_s3 = inlined_call_operand.vmem [shape: f32[1,128], index: 3, kind: input, shape index: {}]   ;;  %s2562_s4 = inlined_call_operand.vmem [shape: bf16[96,128], index: 4, kind: input, shape index: {}]   ;;  %s2563_s5 = inlined_call_operand.vmem [shape: f32[96,1], index: 5, kind: input, shape index: {}]   ;;  %s2564_s6 = inlined_call_operand.vmem [shape: bf16[32,128], index: 6, kind: input, shape index: {}]   ;;  %s2565_s7 = inlined_call_operand.vmem [shape: f32[1,128], index: 7, kind: input, shape index: {}]   ;;  %s2566_s8 = inlined_call_operand.vmem [shape: f32[1,128], index: 8, kind: input, shape index: {}]   ;;  %s2567_s9 = inlined_call_operand.vmem [shape: f32[1,128], index: 9, kind: input, shape index: {}]   ;;  %s2568_s10 = inlined_call_operand.vmem [shape: bf16[128,128], index: 10, kind: input, shape index: {}]   ;;  %s2569_s11 = inlined_call_operand.vmem [shape: f32[1,128], index: 11, kind: input, shape index: {}]   ;;  %s2570_s12 = inlined_call_operand.vmem [shape: bf16[128,128], index: 12, kind: input, shape index: {}]   ;;  %s2571_s13 = inlined_call_operand.vmem [shape: f32[1,128], index: 13, kind: input, shape index: {}]   ;;  %s2572_s14 = inlined_call_operand.vmem [shape: f32[1,128], index: 14, kind: input, shape index: {}]   ;;  %s2573_s15 = inlined_call_operand.vmem [shape: f32[1,128], index: 15, kind: input, shape index: {}]   ;;  %s2574_s16 = inlined_call_operand.vmem [shape: f32[16,128], index: 16, kind: output, shape index: {}]  }
   0x1   :  { %2575 = sst [smem:[#allocation2_spill]] %s2558_s0 }
   0x2 LB: > { %s2257_s22 = sadd.s32 4294967295, %s2161_s21   ;;  %p1872_p0 = scmp.ge.s32.totalorder %s2161_s21, 1  ;;  %s2161_s21 = sphi %s2251_s21, %s26_s21  }
   0x3   : > { %p461_p1 = scmp.lt.s32.totalorder %s2161_s21, 3 }
   0x5   : > { %p462_p2 = pnand %p1872_p0, %p461_p1 }
   0x6   : > { %p509_p3 = scmp.lt.s32.totalorder (!%p462_p2), %s2257_s22, 1  ;;  %s2576_s27 = sld [smem:[#allocation2_spill]] (!%p462_p2)  ;;  %v2163_v1 = vmov (!%p462_p2), 0.0   ;;  %v518_v2 = vlaneseq (!%p462_p2)  ;;  %v2109_v10 = vld [vmem:[%s2562_s4] sm:$0xff] (!%p462_p2)   ;;  %v2164_v12 = vmov (!%p462_p2), 0   ;;  %v2110_v24 = vld [vmem:[%s2562_s4 + $0x8] sm:$0xff] (!%p462_p2)  }
   0x7   : > { %465 = sbr.rel (%p462_p2) target bundleno = 4778 (0x12aa), region = 84  ;;  %1984 = vmatprep.subr.bf16.mxu1 (!%p462_p2), %v2163_v1  ;;  %1972 = vmatprep.mubr.bf16.mxu0 (!%p462_p2), %v2109_v10  ;;  %v569_v11 = vld [vmem:[%s2563_s5] sm:$0xff] (!%p462_p2)  ;;  %v2111_v25 = vld [vmem:[%s2562_s4 + $0x10] sm:$0xff] (!%p462_p2)   ;;  %v2112_v26 = vld [vmem:[%s2562_s4 + $0x18] sm:$0xff] (!%p462_p2)   ;;  %vm2165_vm1 = vmmov (!%p462_p2), 0   ;;  %vm785_vm2 = vcmask (!%p462_p2), 1043456   ;;  %s552_s29 = scalar_lea.vmem (!%p462_p2), %s2559_s1, %s2257_s22 }
   0x8   : > { %v519_v3 = vand.u32 (!%p462_p2), 127, %v518_v2  ;;  %2107 = vset.pattern.permute.xlu1 (!%p462_p2), %v2164_v12  ;;  %v573_v13 = vld [vmem:[%s2563_s5 + $0x20] sm:$0xff] (!%p462_p2)  ;;  %1986 = vmatprep.mubr.msk.bf16.mxu1 (!%p462_p2), %vm2165_vm1, %v2163_v1  ;;  %v2114_v28 = vld [vmem:[%s2562_s4 + $0x28] sm:$0xff] (!%p462_p2)   ;;  %vm781_vm3 = vcmask (!%p462_p2), 64512   ;;  %v762_v47 = vshrl.u32 (!%p462_p2), %v518_v2, 7  ;;  %v571_v10 = vld [vmem:[%s2563_s5 + $0x10] sm:$0xff] (!%p462_p2) }
   0x9   : > { %583 = vperm.xlu1 (!%p462_p2), %2107, %v569_v11   ;;  %v1876_v18 = vld [vmem:[%s2560_s2] ss:$0 sm:$0xff] (!%p462_p2)  ;;  %v570_v57 = vld [vmem:[%s2563_s5 + $0x8] sm:$0xff] (!%p462_p2)  ;;  %v575_v11 = vld [vmem:[%s2563_s5 + $0x30] sm:$0xff] (!%p462_p2) }
   0xa   : > { %vm520_vm0 = vcmp.lt.s32.totalorder (!%p462_p2), %v519_v3, 32  ;;  %v1877_v20 = vld [vmem:[%s2561_s3] ss:$0 sm:$0xff] (!%p462_p2)  ;;  %v763_v49 = vsub.s32 (!%p462_p2), 0, %v762_v47  ;;  %v574_v61 = vld [vmem:[%s2563_s5 + $0x28] sm:$0xff] (!%p462_p2) }
   0xb   : > { %v2274_v6 = vsel (!%p462_p2), %vm520_vm0, 1.0, %v2163_v1  ;;  %v2113_v27 = vld [vmem:[%s2562_s4 + $0x20] sm:$0xff] (!%p462_p2)  }
   0xc   : > { %v553_v45 = vld [vmem:[%s552_s29] sm:$0x1] (!%p462_p2) }
   0xd   : > { %603 = vperm.xlu1 (!%p462_p2), %2107, %v573_v13   ;;  %v554_v46 = vsub.f32 (!%p462_p2), 1.0, %v553_v45  ;;  %v577_v58 = vld [vmem:[%s2563_s5 + $0x40] sm:$0xff] (!%p462_p2)  ;;  %v578_v45 = vld [vmem:[%s2563_s5 + $0x48] sm:$0xff] (!%p462_p2) }
   0xe   : > { %s2263_s23 = scalar_select %p509_p3, %s2257_s22, 1 }
   0xf   : > { %v555_v48 = vmul.f32 -1e+09, %v554_v46 }
  0x10   : > { %s1873_s24 = sshll.u32 %s2263_s23, 3 }
  0x11   : > { %s512_s28 = scalar_lea.vmem %s2576_s27, %s1873_s24  ;;  %v2335_v50 = vrot.slane %v555_v48, %v763_v49  ;;  %v572_v49 = vld [vmem:[%s2563_s5 + $0x18] sm:$0xff]  ;;  %s516_s18 = scalar_lea.vmem %s2574_s16, %s1873_s24 }
  0x12   : > { %v523_v0 = vld [vmem:[%s512_s28] sm:$0xff] }
  0x13   : > { %526 = vadd.xlane.f32.xlu0 %v523_v0 }
  0x88   : > { %v584_v30 = vpop.permute.xlu1 %583 }
  0x8c   : > { %v604_v37 = vpop.permute.xlu1 %603 }
  0xa0   : > { %v527_v4 = vpop.xlane.xlu0 %526 }
  0xa1   : > { %v528_v5 = vmul.f32 0.03125, %v527_v4 }
  0xa3   : > { %v529_v7 = vsub.f32 %v523_v0, %v528_v5 }
  0xa5   : > { %v530_v8 = vmul.f32 %v2274_v6, %v529_v7 }
  0xa7   : > { %v531_v9 = vmul.f32 %v530_v8, %v530_v8 }
  0xa9   : > { %532 = vadd.xlane.f32.xlu0 %v531_v9 }
 0x136   : > { %v533_v14 = vpop.xlane.xlu0 %532 }
 0x137   : > { %v534_v15 = vmul.f32 0.03125, %v533_v14 }
 0x139   : > { %v535_v16 = vadd.f32 1e-12, %v534_v15 }
 0x13b   : > { %2131 = vrsqrt.f32 %v535_v16 }
 0x145   : > { %v2132_v17 = vpop.eup %2131 }
 0x146   : > { %v537_v19 = vmul.f32 %v2132_v17, %v530_v8 }
 0x148   : > { %v544_v21 = vmul.f32 %v1876_v18, %v537_v19 }
 0x14a   : > { %v2293_v22 = vadd.f32 %v1877_v20, %v544_v21 }
 0x14c   : > { %v556_v23 = vpack.c.bf16 %v2293_v22, %v2293_v22 }
 0x14e   : > { %1970 = vmatprep.subr.bf16.mxu0 %v556_v23 }
 0x14f   : > { %1971 = vmatpush3.bf16.xpose.msra.mxu0 %v556_v23 }
 0x150   : > { %2008 = vmatprep.subr.bf16.mxu0 %v2163_v1 }
 0x156   : > { %1973 = vmatmul.mubr.bf16.vlgmr.msra.gmra.mrb[0].mxu0 %v2110_v24 }
 0x157   : > { %1976 = vmatprep.mubr.bf16.mxu0 %v2111_v25 }
 0x15e   : > { %1977 = vmatmul.mubr.bf16.gmra.mrb[4].mxu0 %v2112_v26 }
 0x15f   : > { %1980 = vmatprep.mubr.bf16.mxu0 %v2113_v27 }
 0x166   : > { %1981 = vmatmul.mubr.bf16.gmra.mrb[8].mxu0 %v2114_v28 }
 0x167   : > { %2010 = vmatprep.mubr.msk.bf16.mxu0 %vm2165_vm1, %v2163_v1 }
 0x229   : > { %v2317_v29 = vpop.f32.mrb[0].mxu0 }
 0x22a   : > { %v711_v31 = vpop.f32.mrb[1].mxu0 }
 0x22b   : > { %v712_v32 = vadd.f32 %v711_v31, %v584_v30  ;;  %v2319_v33 = vpop.f32.mrb[2].mxu0 }
 0x22c   : > { %v714_v34 = vpop.f32.mrb[3].mxu0 }
 0x22d   : > { %v758_v35 = vpack.c.bf16 %v712_v32, %v712_v32 }
 0x22f   : > { %765 = vxpose.xlu0.c.b16.start.end [1/1] (short) (narrow) %v758_v35, 16 }
 0x231   : > { %v2321_v36 = vpop.f32.mrb[4].mxu0 }
 0x232   : > { %v727_v38 = vpop.f32.mrb[5].mxu0 }
 0x233   : > { %v728_v39 = vadd.f32 %v727_v38, %v604_v37  ;;  %v2323_v40 = vpop.f32.mrb[6].mxu0 }
 0x234   : > { %v730_v41 = vpop.f32.mrb[7].mxu0 }
 0x235   : > { %v759_v42 = vpack.c.bf16 %v728_v39, %v728_v39 }
 0x237   : > { %v787_v43 = vsel %vm785_vm2, %v759_v42, 0 }
 0x238   : > { %1985 = vmatpush3.bf16.msra.mxu1 %v787_v43 }
 0x239   : > { %1990 = vmatprep.subr.bf16.mxu1 %v2163_v1  ;;  %v2345_v59 = vpop.f32.mrb[8].mxu0 }
 0x23a   : > { %v743_v60 = vpop.f32.mrb[9].mxu0 }
 0x23b   : > { %v2351_v4 = vpop.f32.mrb[10].mxu0 }
 0x23c   : > { %v2353_v5 = vpop.f32.mrb[11].mxu0 }
 0x295   : > { %v773_v44 = vpop.trf.xlu0 }
 0x296   : > { %1987 = vmatmul.mubr.msk.bf16.vlgmr.msra.gmra.mrb[0].mxu1 %vm781_vm3, %v773_v44 }
 0x297   : > { %1992 = vmatprep.mubr.msk.bf16.mxu1 %vm2165_vm1, %v2163_v1 }
 0x369   : > { %v823_v51 = vpop.f32.mrb[0].mxu1 }
 0x36a   : > { %v824_v52 = vadd.f32 %v823_v51, %v2335_v50  ;;  %v1988_v53 = vpop.f32.mrb[1].mxu1 }
 0x36b   : > { %v826_v54 = vpop.f32.mrb[2].mxu1 }
 0x36c   : > { %v1989_v55 = vpop.f32.mrb[3].mxu1  ;;  %v829_v56 = vsel %vm781_vm3, %v824_v52, -inf }
 0x36d   : > { %830 = vmax.xlane.f32.xlu1 %v829_v56 }
 0x37e   : > { %588 = vperm.xlu1 %2107, %v570_v57  }
 0x382   : > { %623 = vperm.xlu1 %2107, %v577_v58   ;;  %v1013_v58 = vld [vmem:[%s2564_s6 + $0x4] sm:$0xf] }
 0x386   : > { %608 = vperm.xlu1 %2107, %v574_v61  }
 0x3fa   : > { %v831_v62 = vpop.xlane.xlu1 %830 }
 0x3fb   : > { %v832_v63 = vsub.f32 %v824_v52, %v831_v62 }
 0x3fd   : > { %v833_v0 = vmul.f32 1.442695, %v832_v63 }
 0x3fe   : > { %v589_v7 = vpop.permute.xlu1 %588 }
 0x3ff   : > { %2133 = vpow2.f32 %v833_v0  ;;  %v715_v8 = vadd.f32 %v714_v34, %v589_v7 }
 0x401   : > { %v889_v9 = vpack.c.bf16 %v715_v8, %v715_v8 }
 0x402   : > { %v624_v14 = vpop.permute.xlu1 %623 }
 0x403   : > { %v744_v21 = vadd.f32 %v743_v60, %v624_v14  ;;  %v1034_v60 = vsel %vm785_vm2, %v1013_v58, 0 }
 0x404   : > { %2009 = vmatpush3.bf16.msra.mxu0 %v1034_v60 }
 0x405   : > { %v760_v23 = vpack.c.bf16 %v744_v21, %v744_v21  ;;  %2020 = vmatprep.subr.bf16.mxu0 %v2163_v1  ;;  %v579_v21 = vld [vmem:[%s2563_s5 + $0x50] sm:$0xff] }
 0x406   : > { %v609_v17 = vpop.permute.xlu1 %608 }
 0x407   : > { %v731_v19 = vadd.f32 %v730_v41, %v609_v17 }
 0x409   : > { %v2134_v2 = vpop.eup %2133 }
 0x40a   : > { %v835_v3 = vsel %vm781_vm3, %v2134_v2, 0.0 }
 0x40b   : > { %836 = vadd.xlane.f32.xlu0 %v835_v3 }
 0x438   : > { %892 = vxpose.xlu0.c.b16.start.end [1/1] (short) (narrow) %v889_v9, 16 }
 0x441   : > { %2108 = vset.pattern.permute.xlu0 %v2164_v12  ;;  %v890_v12 = vpack.c.bf16 %v731_v19, %v731_v19 }
 0x442   : > { %593 = vperm.xlu0 %2108, %v571_v10  }
 0x443   : > { %v912_v24 = vsel %vm785_vm2, %v890_v12, 0  ;;  %v576_v12 = vld [vmem:[%s2563_s5 + $0x38] sm:$0xff] }
 0x446   : > { %613 = vperm.xlu0 %2108, %v575_v11  }
 0x498   : > { %v837_v13 = vpop.xlane.xlu0 %836 }
 0x499   : > { %2135 = vrcp.f32 %v837_v13 }
 0x49e   : > { %v900_v25 = vpop.trf.xlu0 }
 0x4a3   : > { %v2136_v15 = vpop.eup %2135 }
 0x4a4   : > { %v839_v16 = vmul.f32 %v2136_v15, %v2134_v2 }
 0x4a6   : > { %v840_v18 = vpack.c.bf16 %v839_v16, %v839_v16 }
 0x4a8   : > { %v845_v20 = vsel %vm781_vm3, %v840_v18, 0 }
 0x4a9   : > { %1991 = vmatpush3.bf16.xpose.msra.mxu1 %v845_v20 }
 0x4aa   : > { %1996 = vmatprep.subr.bf16.mxu1 %v2163_v1 }
 0x4b0   : > { %1993 = vmatmul.mubr.msk.bf16.vlgmr.msra.gmra.mrb[4].mxu1 %vm781_vm3, %v760_v23  ;;  %v888_v23 = vld [vmem:[%s2564_s6] sm:$0xf] }
 0x4b1   : > { %1997 = vmatpush3.bf16.msra.mxu1 %v912_v24  ;;  %1998 = vmatprep.mubr.msk.bf16.mxu1 %vm2165_vm1, %v2163_v1  ;;  %v1096_v24 = vsel %vm785_vm2, %v888_v23, 0 }
 0x4b2   : > { %2002 = vmatprep.subr.bf16.mxu1 %v2163_v1 }
 0x4b8   : > { %1999 = vmatmul.mubr.msk.bf16.vlgmr.msra.gmra.mrb[8].mxu1 %vm781_vm3, %v900_v25 }
 0x4b9   : > { %2004 = vmatprep.mubr.msk.bf16.mxu1 %vm2165_vm1, %v2163_v1 }
 0x4c1   : > { %v594_v46 = vpop.permute.xlu0 %593 }
 0x4c2   : > { %v720_v47 = vadd.f32 %v2317_v29, %v594_v46 }
 0x4c4   : > { %v1138_v48 = vpack.c.bf16 %v720_v47, %v720_v47 }
 0x4c5   : > { %v614_v3 = vpop.permute.xlu0 %613 }
 0x583   : > { %v2372_v26 = vpop.f32.mrb[4].mxu1 }
 0x584   : > { %v1994_v27 = vpop.f32.mrb[5].mxu1  ;;  %v887_v25 = vpack.c.bf16 %v2372_v26, %v2372_v26 }
 0x585   : > { %v884_v28 = vpop.f32.mrb[6].mxu1 }
 0x586   : > { %v1995_v30 = vpop.f32.mrb[7].mxu1 }
 0x58b   : > { %v948_v31 = vpop.f32.mrb[8].mxu1 }
 0x58c   : > { %v949_v32 = vadd.f32 %v948_v31, %v2335_v50  ;;  %v2000_v34 = vpop.f32.mrb[9].mxu1 }
 0x58d   : > { %v951_v35 = vpop.f32.mrb[10].mxu1 }
 0x58e   : > { %v2001_v37 = vpop.f32.mrb[11].mxu1  ;;  %v954_v38 = vsel %vm781_vm3, %v949_v32, -inf }
 0x58f   : > { %955 = vmax.xlane.f32.xlu1 %v954_v38 }
 0x61c   : > { %v956_v39 = vpop.xlane.xlu1 %955 }
 0x61d   : > { %v957_v41 = vsub.f32 %v949_v32, %v956_v39 }
 0x61f   : > { %v958_v42 = vmul.f32 1.442695, %v957_v41 }
 0x621   : > { %2137 = vpow2.f32 %v958_v42 }
 0x62b   : > { %v2138_v43 = vpop.eup %2137 }
 0x62c   : > { %v960_v44 = vsel %vm781_vm3, %v2138_v43, 0.0 }
 0x62d   : > { %961 = vadd.xlane.f32.xlu1 %v960_v44 }
 0x63e   : > { %628 = vperm.xlu1 %2107, %v578_v45  }
 0x661   : > { %1141 = vxpose.xlu1.c.b16.start.end [1/1] (short) (narrow) %v1138_v48, 16 }
 0x665   : > { %598 = vperm.xlu1 %2107, %v572_v49  }
 0x6ba   : > { %v962_v51 = vpop.xlane.xlu1 %961 }
 0x6bb   : > { %2139 = vrcp.f32 %v962_v51 }
 0x6be   : > { %v629_v55 = vpop.permute.xlu1 %628 }
 0x6bf   : > { %v747_v57 = vadd.f32 %v2353_v5, %v629_v55  ;;  %v736_v5 = vadd.f32 %v2321_v36, %v614_v3  ;;  %v1262_v55 = vld [vmem:[%s2564_s6 + $0x8] sm:$0xf] }
 0x6c1   : > { %v891_v29 = vpack.c.bf16 %v747_v57, %v747_v57  ;;  %v1139_v7 = vpack.c.bf16 %v736_v5, %v736_v5 }
 0x6c3   : > { %v1161_v9 = vsel %vm785_vm2, %v1139_v7, 0 }
 0x6c5   : > { %v2140_v52 = vpop.eup %2139 }
 0x6c6   : > { %v964_v53 = vmul.f32 %v2140_v52, %v2138_v43 }
 0x6c7   : > { %v1149_v10 = vpop.trf.xlu1 }
 0x6c8   : > { %v965_v54 = vpack.c.bf16 %v964_v53, %v964_v53 }
 0x6ca   : > { %v970_v56 = vsel %vm781_vm3, %v965_v54, 0 }
 0x6cb   : > { %2003 = vmatpush3.bf16.xpose.msra.mxu1 %v970_v56  ;;  %v1283_v56 = vsel %vm785_vm2, %v1262_v55, 0 }
 0x6cc   : > { %2014 = vmatprep.subr.bf16.mxu1 %v2163_v1 }
 0x6d2   : > { %2005 = vmatmul.mubr.msk.bf16.vlgmr.msra.gmra.mrb[12].mxu1 %vm781_vm3, %v891_v29 }
 0x6d3   : > { %2016 = vmatprep.mubr.msk.bf16.mxu1 %vm2165_vm1, %v2163_v1  ;;  %2015 = vmatpush3.bf16.msra.mxu1 %v1096_v24 }
 0x6d4   : > { %2026 = vmatprep.subr.bf16.mxu1 %v2163_v1 }
 0x6e4   : > { %v599_v26 = vpop.permute.xlu1 %598 }
 0x6e5   : > { %v723_v41 = vadd.f32 %v2319_v33, %v599_v26 }
 0x6e7   : > { %v1326_v42 = vpack.c.bf16 %v723_v41, %v723_v41 }
 0x7a5   : > { %v1006_v61 = vpop.f32.mrb[12].mxu1 }
 0x7a6   : > { %v1012_v62 = vpack.c.bf16 %v1006_v61, %v1006_v61  ;;  %v2006_v63 = vpop.f32.mrb[13].mxu1 }
 0x7a7   : > { %v1009_v0 = vpop.f32.mrb[14].mxu1 }
 0x7a8   : > { %1014 = vxpose.xlu0.c.b16.start.end [1/1] (short) (narrow) %v1012_v62, 16  ;;  %v2007_v2 = vpop.f32.mrb[15].mxu1 }
 0x80e   : > { %v1022_v8 = vpop.trf.xlu0 }
 0x80f   : > { %2011 = vmatmul.mubr.msk.bf16.vlgmr.msra.gmra.mrb[12].mxu0 %vm781_vm3, %v1022_v8 }
 0x810   : > { %2021 = vmatpush3.bf16.msra.mxu0 %v1161_v9  ;;  %2022 = vmatprep.mubr.msk.bf16.mxu0 %vm2165_vm1, %v2163_v1 }
 0x811   : > { %2032 = vmatprep.subr.bf16.mxu0 %v2163_v1 }
 0x817   : > { %2023 = vmatmul.mubr.msk.bf16.vlgmr.msra.gmra.mrb[16].mxu0 %vm781_vm3, %v1149_v10 }
 0x818   : > { %2034 = vmatprep.mubr.msk.bf16.mxu0 %vm2165_vm1, %v2163_v1  ;;  %2033 = vmatpush3.bf16.msra.mxu0 %v1283_v56 }
 0x819   : > { %2044 = vmatprep.subr.bf16.mxu0 %v2163_v1 }
 0x8e2   : > { %v1070_v11 = vpop.f32.mrb[12].mxu0 }
 0x8e3   : > { %v2012_v36 = vpop.f32.mrb[13].mxu0 }
 0x8e4   : > { %v1073_v13 = vpop.f32.mrb[14].mxu0 }
 0x8e5   : > { %v2013_v14 = vpop.f32.mrb[15].mxu0 }
 0x8ea   : > { %v1197_v15 = vpop.f32.mrb[16].mxu0 }
 0x8eb   : > { %v1198_v16 = vadd.f32 %v1197_v15, %v2335_v50  ;;  %v2024_v17 = vpop.f32.mrb[17].mxu0 }
 0x8ec   : > { %v1200_v18 = vpop.f32.mrb[18].mxu0 }
 0x8ed   : > { %v2025_v19 = vpop.f32.mrb[19].mxu0  ;;  %v1203_v20 = vsel %vm781_vm3, %v1198_v16, -inf }
 0x8ee   : > { %1204 = vmax.xlane.f32.xlu0 %v1203_v20 }
 0x904   : > { %633 = vperm.xlu0 %2108, %v579_v21  }
 0x908   : > { %618 = vperm.xlu0 %2108, %v576_v12  }
 0x926   : > { %1076 = vxpose.xlu0.c.b16.start.end [1/1] (short) (narrow) %v887_v25, 16 }
 0x97b   : > { %v1205_v27 = vpop.xlane.xlu0 %1204 }
 0x97c   : > { %v1206_v28 = vsub.f32 %v1198_v16, %v1205_v27  ;;  %v1450_v27 = vld [vmem:[%s2564_s6 + $0xc] sm:$0xf] }
 0x97e   : > { %v1207_v30 = vmul.f32 1.442695, %v1206_v28  ;;  %v1471_v28 = vsel %vm785_vm2, %v1450_v27, 0  ;;  %v1908_v27 = vld [vmem:[%s2571_s13] ss:$0 sm:$0xff] }
 0x980   : > { %2141 = vpow2.f32 %v1207_v30 }
 0x983   : > { %v634_v31 = vpop.permute.xlu0 %633 }
 0x984   : > { %v752_v32 = vadd.f32 %v2345_v59, %v634_v31 }
 0x986   : > { %v1140_v47 = vpack.c.bf16 %v752_v32, %v752_v32 }
 0x987   : > { %v619_v34 = vpop.permute.xlu0 %618 }
 0x988   : > { %v739_v35 = vadd.f32 %v2323_v40, %v619_v34 }
 0x98a   : > { %v2142_v37 = vpop.eup %2141  ;;  %v1327_v46 = vpack.c.bf16 %v739_v35, %v739_v35 }
 0x98b   : > { %v1209_v38 = vsel %vm781_vm3, %v2142_v37, 0.0 }
 0x98c   : > { %1210 = vadd.xlane.f32.xlu1 %v1209_v38  ;;  %v1084_v39 = vpop.trf.xlu0  ;;  %v1349_v48 = vsel %vm785_vm2, %v1327_v46, 0  ;;  %v1896_v38 = vld [vmem:[%s2565_s7] ss:$0 sm:$0xff] }
 0x98d   : > { %2017 = vmatmul.mubr.msk.bf16.vlgmr.msra.gmra.mrb[16].mxu1 %vm781_vm3, %v1084_v39 }
 0x98e   : > { %2028 = vmatprep.mubr.msk.bf16.mxu1 %vm2165_vm1, %v2163_v1 }
 0x9b9   : > { %1329 = vxpose.xlu1.c.b16.start.end [1/1] (short) (narrow) %v1326_v42, 16 }
 0xa19   : > { %v1211_v43 = vpop.xlane.xlu1 %1210 }
 0xa1a   : > { %2143 = vrcp.f32 %v1211_v43 }
 0xa1f   : > { %v1337_v33 = vpop.trf.xlu1 }
 0xa24   : > { %v2144_v59 = vpop.eup %2143 }
 0xa25   : > { %v1213_v44 = vmul.f32 %v2144_v59, %v2142_v37 }
 0xa27   : > { %v1214_v40 = vpack.c.bf16 %v1213_v44, %v1213_v44  ;;  %v2115_v44 = vld [vmem:[%s2568_s10] sm:$0xff]  }
 0xa29   : > { %v1219_v45 = vsel %vm781_vm3, %v1214_v40, 0  ;;  %v2116_v40 = vld [vmem:[%s2568_s10 + $0x8] sm:$0xff]  }
 0xa2a   : > { %2027 = vmatpush3.bf16.xpose.msra.mxu1 %v1219_v45 }
 0xa2b   : > { %2038 = vmatprep.subr.bf16.mxu1 %v2163_v1 }
 0xa31   : > { %2029 = vmatmul.mubr.msk.bf16.vlgmr.msra.gmra.mrb[20].mxu1 %vm781_vm3, %v1140_v47 }
 0xa32   : > { %2039 = vmatpush3.bf16.msra.mxu1 %v1349_v48  ;;  %2040 = vmatprep.mubr.msk.bf16.mxu1 %vm2165_vm1, %v2163_v1 }
 0xa33   : > { %2050 = vmatprep.subr.bf16.mxu1 %v2163_v1 }
 0xa39   : > { %2041 = vmatmul.mubr.msk.bf16.vlgmr.msra.gmra.mrb[24].mxu1 %vm781_vm3, %v1337_v33  ;;  %v2117_v33 = vld [vmem:[%s2568_s10 + $0x10] sm:$0xff]  }
 0xa3a   : > { %2052 = vmatprep.mubr.msk.bf16.mxu1 %vm2165_vm1, %v2163_v1  ;;  %2051 = vmatpush3.bf16.msra.mxu1 %v1471_v28 }
 0xa3b   : > { %2076 = vmatprep.subr.bf16.mxu1 %v2163_v1 }
 0xa60   : > { %v1132_v49 = vpop.f32.mrb[16].mxu1 }
 0xa61   : > { %v1133_v51 = vadd.f32 %v1132_v49, %v1070_v11  ;;  %v2018_v52 = vpop.f32.mrb[17].mxu1  ;;  %v2118_v49 = vld [vmem:[%s2568_s10 + $0x18] sm:$0xff]  }
 0xa62   : > { %v1135_v53 = vpop.f32.mrb[18].mxu1  ;;  %v2120_v52 = vld [vmem:[%s2568_s10 + $0x28] sm:$0xff]  }
 0xa63   : > { %v2019_v54 = vpop.f32.mrb[19].mxu1  ;;  %v2121_v53 = vld [vmem:[%s2568_s10 + $0x30] sm:$0xff]  }
 0xa64   : > { %v2122_v54 = vld [vmem:[%s2568_s10 + $0x38] sm:$0xff]  }
 0xb04   : > { %v1255_v57 = vpop.f32.mrb[20].mxu1 }
 0xb05   : > { %v1261_v29 = vpack.c.bf16 %v1255_v57, %v1255_v57  ;;  %v2030_v58 = vpop.f32.mrb[21].mxu1 }
 0xb06   : > { %v1258_v60 = vpop.f32.mrb[22].mxu1  ;;  %v1897_v58 = vld [vmem:[%s2566_s8] ss:$0 sm:$0xff] }
 0xb07   : > { %1263 = vxpose.xlu1.c.b16.start.end [1/1] (short) (narrow) %v1261_v29, 16  ;;  %v2031_v61 = vpop.f32.mrb[23].mxu1 }
 0xb08   : > { %v1898_v61 = vld [vmem:[%s2567_s9] ss:$0 sm:$0xff] }
 0xb0c   : > { %v1385_v62 = vpop.f32.mrb[24].mxu1 }
 0xb0d   : > { %v1386_v63 = vadd.f32 %v1385_v62, %v2335_v50  ;;  %v2042_v0 = vpop.f32.mrb[25].mxu1  ;;  %v580_v50 = vld [vmem:[%s2563_s5 + $0x58] sm:$0xff] }
 0xb0e   : > { %v1388_v2 = vpop.f32.mrb[26].mxu1 }
 0xb0f   : > { %v2043_v3 = vpop.f32.mrb[27].mxu1  ;;  %v1391_v5 = vsel %vm781_vm3, %v1386_v63, -inf  ;;  %v2123_v2 = vld [vmem:[%s2570_s12] sm:$0xff]  }
 0xb10   : > { %1392 = vmax.xlane.f32.xlu0 %v1391_v5  ;;  %v2124_v3 = vld [vmem:[%s2570_s12 + $0x8] sm:$0xff]   ;;  %v2125_v5 = vld [vmem:[%s2570_s12 + $0x10] sm:$0xff]  }
 0xb6d   : > { %v1271_v7 = vpop.trf.xlu1 }
 0xb6e   : > { %2035 = vmatmul.mubr.msk.bf16.vlgmr.msra.gmra.mrb[20].mxu0 %vm781_vm3, %v1271_v7  ;;  %v2126_v7 = vld [vmem:[%s2570_s12 + $0x18] sm:$0xff]  }
 0xb6f   : > { %2046 = vmatprep.mubr.msk.bf16.mxu0 %vm2165_vm1, %v2163_v1 }
 0xb9d   : > { %v1393_v8 = vpop.xlane.xlu0 %1392 }
 0xb9e   : > { %v1394_v9 = vsub.f32 %v1386_v63, %v1393_v8  ;;  %v2127_v8 = vld [vmem:[%s2570_s12 + $0x20] sm:$0xff]  }
 0xba0   : > { %v1395_v10 = vmul.f32 1.442695, %v1394_v9  ;;  %v2128_v9 = vld [vmem:[%s2570_s12 + $0x28] sm:$0xff]  }
 0xba2   : > { %2145 = vpow2.f32 %v1395_v10  ;;  %v2129_v10 = vld [vmem:[%s2570_s12 + $0x30] sm:$0xff]  }
 0xbac   : > { %v2146_v11 = vpop.eup %2145 }
 0xbad   : > { %v1397_v36 = vsel %vm781_vm3, %v2146_v11, 0.0 }
 0xbae   : > { %1398 = vadd.xlane.f32.xlu0 %v1397_v36  ;;  %v1899_v36 = vld [vmem:[%s2569_s11] ss:$0 sm:$0xff] }
 0xbc4   : > { %638 = vperm.xlu0 %2108, %v580_v50  }
 0xc3b   : > { %v1399_v13 = vpop.xlane.xlu0 %1398 }
 0xc3c   : > { %2147 = vrcp.f32 %v1399_v13 }
 0xc41   : > { %v1319_v14 = vpop.f32.mrb[20].mxu0 }
 0xc42   : > { %v1325_v15 = vadd.f32 %v1319_v14, %v1133_v51  ;;  %v2036_v16 = vpop.f32.mrb[21].mxu0  ;;  %v2119_v51 = vld [vmem:[%s2568_s10 + $0x20] sm:$0xff]  }
 0xc43   : > { %v1322_v17 = vpop.f32.mrb[22].mxu0  ;;  %v639_v12 = vpop.permute.xlu0 %638 }
 0xc44   : > { %v2037_v18 = vpop.f32.mrb[23].mxu0  ;;  %v755_v24 = vadd.f32 %v2351_v4, %v639_v12 }
 0xc46   : > { %v2148_v19 = vpop.eup %2147  ;;  %v1328_v25 = vpack.c.bf16 %v755_v24, %v755_v24 }
 0xc47   : > { %v1401_v20 = vmul.f32 %v2148_v19, %v2146_v11  ;;  %v2130_v11 = vld [vmem:[%s2570_s12 + $0x38] sm:$0xff]  }
 0xc49   : > { %v1402_v21 = vpack.c.bf16 %v1401_v20, %v1401_v20 }
 0xc4b   : > { %v1407_v23 = vsel %vm781_vm3, %v1402_v21, 0 }
 0xc4c   : > { %2045 = vmatpush3.bf16.xpose.msra.mxu0 %v1407_v23 }
 0xc4d   : > { %2056 = vmatprep.subr.bf16.mxu0 %v2163_v1 }
 0xc53   : > { %2047 = vmatmul.mubr.msk.bf16.vlgmr.msra.gmra.mrb[24].mxu0 %vm781_vm3, %v1328_v25 }
 0xc54   : > { %2072 = vmatprep.mubr.msk.bf16.mxu0 %vm2165_vm1, %v2163_v1  ;;  %2057 = vmatpush3.bf16.msra.mxu0 %v2115_v44  ;;  %v1917_v44 = vld [vmem:[%s2572_s14] ss:$0 sm:$0xff] }
 0xc55   : > { %2058 = vmatprep.subr.bf16.mxu0 %v2163_v1 }
 0xc58   : > { %2059 = vmatpush3.bf16.msra.mxu0 %v2116_v40 }
 0xc59   : > { %2060 = vmatprep.subr.bf16.mxu0 %v2163_v1 }
 0xc5c   : > { %2061 = vmatpush3.bf16.msra.mxu0 %v2117_v33 }
 0xc5d   : > { %2062 = vmatprep.subr.bf16.mxu0 %v2163_v1 }
 0xc60   : > { %2063 = vmatpush3.bf16.msra.mxu0 %v2118_v49 }
 0xc61   : > { %2064 = vmatprep.subr.bf16.mxu0 %v2163_v1 }
 0xc64   : > { %2065 = vmatpush3.bf16.msra.mxu0 %v2119_v51 }
 0xc65   : > { %2066 = vmatprep.subr.bf16.mxu0 %v2163_v1 }
 0xc68   : > { %2067 = vmatpush3.bf16.msra.mxu0 %v2120_v52 }
 0xc69   : > { %2068 = vmatprep.subr.bf16.mxu0 %v2163_v1 }
 0xc6c   : > { %2069 = vmatpush3.bf16.msra.mxu0 %v2121_v53 }
 0xc6d   : > { %2070 = vmatprep.subr.bf16.mxu0 %v2163_v1 }
 0xc70   : > { %2071 = vmatpush3.bf16.msra.mxu0 %v2122_v54 }
 0xd26   : > { %v1443_v30 = vpop.f32.mrb[24].mxu0 }
 0xd27   : > { %v1449_v31 = vpack.c.bf16 %v1443_v30, %v1443_v30  ;;  %v2048_v4 = vpop.f32.mrb[25].mxu0 }
 0xd28   : > { %v1446_v32 = vpop.f32.mrb[26].mxu0 }
 0xd29   : > { %1451 = vxpose.xlu1.c.b16.start.end [1/1] (short) (narrow) %v1449_v31, 16  ;;  %v2049_v34 = vpop.f32.mrb[27].mxu0 }
 0xd8f   : > { %v1459_v35 = vpop.trf.xlu1 }
 0xd90   : > { %2053 = vmatmul.mubr.msk.bf16.vlgmr.msra.gmra.mrb[28].mxu1 %vm781_vm3, %v1459_v35 }
 0xd91   : > { %2092 = vmatprep.mubr.msk.bf16.mxu1 %vm2165_vm1, %v2163_v1  ;;  %2077 = vmatpush3.bf16.msra.mxu1 %v2123_v2 }
 0xd92   : > { %2078 = vmatprep.subr.bf16.mxu1 %v2163_v1 }
 0xd95   : > { %2079 = vmatpush3.bf16.msra.mxu1 %v2124_v3 }
 0xd96   : > { %2080 = vmatprep.subr.bf16.mxu1 %v2163_v1 }
 0xd99   : > { %2081 = vmatpush3.bf16.msra.mxu1 %v2125_v5 }
 0xd9a   : > { %2082 = vmatprep.subr.bf16.mxu1 %v2163_v1 }
 0xd9d   : > { %2083 = vmatpush3.bf16.msra.mxu1 %v2126_v7 }
 0xd9e   : > { %2084 = vmatprep.subr.bf16.mxu1 %v2163_v1 }
 0xda1   : > { %2085 = vmatpush3.bf16.msra.mxu1 %v2127_v8 }
 0xda2   : > { %2086 = vmatprep.subr.bf16.mxu1 %v2163_v1 }
 0xda5   : > { %2087 = vmatpush3.bf16.msra.mxu1 %v2128_v9 }
 0xda6   : > { %2088 = vmatprep.subr.bf16.mxu1 %v2163_v1 }
 0xda9   : > { %2089 = vmatpush3.bf16.msra.mxu1 %v2129_v10 }
 0xdaa   : > { %2090 = vmatprep.subr.bf16.mxu1 %v2163_v1 }
 0xdad   : > { %2091 = vmatpush3.bf16.msra.mxu1 %v2130_v11 }
 0xe63   : > { %v1507_v37 = vpop.f32.mrb[28].mxu1 }
 0xe64   : > { %v1513_v39 = vadd.f32 %v1507_v37, %v1325_v15  ;;  %v2054_v26 = vpop.f32.mrb[29].mxu1 }
 0xe65   : > { %v1510_v41 = vpop.f32.mrb[30].mxu1 }
 0xe66   : > { %v1521_v42 = vadd.f32 %v1896_v38, %v1513_v39  ;;  %v2055_v43 = vpop.f32.mrb[31].mxu1 }
 0xe68   : > { %v1522_v59 = vadd.f32 %v1521_v42, %v2293_v22 }
 0xe6a   : > { %1525 = vadd.xlane.f32.xlu1 %v1522_v59 }
 0xef7   : > { %v1526_v45 = vpop.xlane.xlu1 %1525 }
 0xef8   : > { %v1527_v46 = vmul.f32 0.03125, %v1526_v45  ;;  %v1918_v45 = vld [vmem:[%s2573_s15] ss:$0 sm:$0xff] }
 0xefa   : > { %v1528_v47 = vsub.f32 %v1522_v59, %v1527_v46 }
 0xefc   : > { %v1529_v22 = vmul.f32 %v2274_v6, %v1528_v47 }
 0xefe   : > { %v1530_v48 = vmul.f32 %v1529_v22, %v1529_v22 }
 0xf00   : > { %1531 = vadd.xlane.f32.xlu0 %v1530_v48 }
 0xf8d   : > { %v1532_v55 = vpop.xlane.xlu0 %1531 }
 0xf8e   : > { %v1533_v56 = vmul.f32 0.03125, %v1532_v55 }
 0xf90   : > { %v1534_v57 = vadd.f32 1e-12, %v1533_v56 }
 0xf92   : > { %2149 = vrsqrt.f32 %v1534_v57 }
 0xf9c   : > { %v2150_v29 = vpop.eup %2149 }
 0xf9d   : > { %v1536_v60 = vmul.f32 %v2150_v29, %v1529_v22 }
 0xf9f   : > { %v1543_v62 = vmul.f32 %v1897_v58, %v1536_v60 }
 0xfa1   : > { %v1550_v63 = vadd.f32 %v1898_v61, %v1543_v62 }
 0xfa3   : > { %v1551_v0 = vpack.c.bf16 %v1550_v63, %v1550_v63 }
 0xfa5   : > { %2073 = vmatmul.mubr.bf16.vlgmr.msra.gmra.mrb[28].mxu0 %v1551_v0 }
0x1078   : > { %v1657_v50 = vpop.f32.mrb[28].mxu0 }
0x1079   : > { %v1658_v13 = vadd.f32 %v1899_v36, %v1657_v50  ;;  %v2074_v14 = vpop.f32.mrb[29].mxu0 }
0x107a   : > { %v1660_v15 = vpop.f32.mrb[30].mxu0 }
0x107b   : > { %v1663_v16 = vmul.f32 %v1658_v13, %v1658_v13  ;;  %v2075_v17 = vpop.f32.mrb[31].mxu0 }
0x107d   : > { %v1664_v18 = vmul.f32 %v1663_v16, %v1658_v13 }
0x107f   : > { %v1665_v19 = vmul.f32 0.044715, %v1664_v18 }
0x1081   : > { %v1666_v20 = vadd.f32 %v1665_v19, %v1658_v13 }
0x1083   : > { %v1667_v21 = vmul.f32 0.7978846, %v1666_v20 }
0x1085   : > { %2151 = vtanh.f32 %v1667_v21 }
0x108f   : > { %v2152_v12 = vpop.eup %2151 }
0x1090   : > { %v1669_v23 = vadd.f32 1.0, %v2152_v12 }
0x1092   : > { %v1670_v24 = vmul.f32 0.5, %v1669_v23 }
0x1094   : > { %v1671_v1 = vmul.f32 %v1670_v24, %v1658_v13 }
0x1096   : > { %v1672_v25 = vpack.c.bf16 %v1671_v1, %v1671_v1 }
0x1098   : > { %2093 = vmatmul.mubr.bf16.vlgmr.msra.gmra.mrb[32].mxu1 %v1672_v25 }
0x116b   : > { %v1778_v28 = vpop.f32.mrb[32].mxu1 }
0x116c   : > { %v1779_v30 = vadd.f32 %v1908_v27, %v1778_v28  ;;  %v2094_v31 = vpop.f32.mrb[33].mxu1 }
0x116d   : > { %v1781_v4 = vpop.f32.mrb[34].mxu1 }
0x116e   : > { %v2095_v32 = vpop.f32.mrb[35].mxu1  ;;  %v1784_v34 = vadd.f32 %v1779_v30, %v1550_v63 }
0x1170   : > { %1787 = vadd.xlane.f32.xlu1 %v1784_v34 }
0x11fd   : > { %v1788_v35 = vpop.xlane.xlu1 %1787 }
0x11fe   : > { %v1789_v37 = vmul.f32 0.03125, %v1788_v35 }
0x1200   : > { %v1790_v38 = vsub.f32 %v1784_v34, %v1789_v37 }
0x1202   : > { %v1791_v39 = vmul.f32 %v2274_v6, %v1790_v38 }
0x1204   : > { %v1792_v26 = vmul.f32 %v1791_v39, %v1791_v39 }
0x1206   : > { %1793 = vadd.xlane.f32.xlu1 %v1792_v26 }
0x1293   : > { %v1794_v41 = vpop.xlane.xlu1 %1793 }
0x1294   : > { %v1795_v42 = vmul.f32 0.03125, %v1794_v41 }
0x1296   : > { %v1796_v43 = vadd.f32 1e-12, %v1795_v42 }
0x1298   : > { %2153 = vrsqrt.f32 %v1796_v43 }
0x12a2   : > { %v2154_v59 = vpop.eup %2153 }
0x12a3   : > { %v1798_v40 = vmul.f32 %v2154_v59, %v1791_v39 }
0x12a5   : > { %v1805_v46 = vmul.f32 %v1917_v44, %v1798_v40 }
0x12a7   : > { %v1812_v6 = vadd.f32 %v1918_v45, %v1805_v46 }
0x12a9   : > { %1813 = vst [vmem:[%s516_s18] sm:$0xff] %v1812_v6 }
0x12aa PF: > { %s26_s21 = sadd.s32 1, %s2161_s21  }
0x12ab   : > { %p23_p4 = scmp.ge.s32.totalorder %s26_s21, 4  }
0x12ad   :  { %25 = sbr.rel (!%p23_p4) target bundleno = 2 (0x2), region = 115 }

</bundles_post_ra>
